<compile_context>
chip_gen: v5e
topology: v5e:2x2
jax: 0.10.0
libtpu: 0.0.40
codegen_flags: <defaults>
</compile_context>

<pallas_src>
import functools

import jax
import jax.numpy as jnp
from jax.experimental import pallas as pl
from jax.experimental.pallas import tpu as pltpu


def _expand_norm_shuffle_kernel(x_ref, w_ref, gr_ref, gs_ref, gh_ref, o_ref,
                                *, th, W, dim, eps):
    # x_ref:  (1, th*W, dim)         row-band of input tokens
    # w_ref:  (dim, 16*dim)          expand weight (constant index -> resident)
    # gr_ref: (16*dim, 16)  f32      block-diagonal 1/dim  -> per-group mean
    # gs_ref: (16, 16*dim)  f32      gamma-weighted block-diagonal broadcast
    # gh_ref: (17, 16*dim)  f32      rows 0..15 = gs, row 16 = beta (tiled)
    # o_ref:  (1, th, 4, W, 4*dim)   pixel-shuffled, lane-dense output tile
    x = x_ref[0]                                                        # (th*W, dim)
    y = jnp.dot(x, w_ref[...], preferred_element_type=jnp.float32)     # (th*W, 16*dim) f32

    # Per output-pixel LayerNorm over each dim-sized channel group (p1, p2),
    # kept lane-dense: group reduce + broadcast-back run on the MXU.
    mean = jnp.dot(y, gr_ref[...], preferred_element_type=jnp.float32)     # (th*W, 16)
    msq = jnp.dot(y * y, gr_ref[...], preferred_element_type=jnp.float32)  # (th*W, 16)
    inv = jax.lax.rsqrt(msq - mean * mean + eps)                           # (th*W, 16)
    shift_stats = jnp.concatenate(
        [-mean * inv, jnp.ones((inv.shape[0], 1), jnp.float32)], axis=1)   # (th*W, 17)
    scale = jnp.dot(inv, gs_ref[...], preferred_element_type=jnp.float32)        # (th*W, 16*dim)
    shift = jnp.dot(shift_stats, gh_ref[...], preferred_element_type=jnp.float32)
    yn = (y * scale + shift).astype(o_ref.dtype)                           # (th*W, 16*dim)

    # Fused pixel shuffle: channel k = p1*(4*dim) + p2*dim + c.  Each p1 gives
    # a lane-aligned (th*W, 4*dim) slice that maps to the (th, W, 4*dim)
    # destination sub-block with only a sublane split (no lane relayout).
    for p1 in range(4):
        o_ref[0, :, p1, :, :] = (
            yn[:, p1 * 4 * dim:(p1 + 1) * 4 * dim].reshape(th, W, 4 * dim))


def _vmem_capacity_bytes():
    try:
        return int(pltpu.get_tpu_info().vmem_capacity_bytes)
    except Exception:
        return 64 << 20  # conservative (v7x per-TensorCore VMEM)


def _choose_row_tile(H, W, dim, out_itemsize, batch, target_block_bytes):
    """Largest row tile TH dividing H whose output block fits the target.

    Constraints: input block sublane dim (th*W) % 8 == 0 unless th == H.
    Prefers an even total grid when batch is odd (keeps both v7x TCs busy).
    """
    def out_block_bytes(t):
        return 16 * t * W * dim * out_itemsize

    candidates = [t for t in range(1, H + 1)
                  if H % t == 0 and (t == H or (t * W) % 8 == 0)]
    if not candidates:
        return H
    fitting = [t for t in candidates if out_block_bytes(t) <= target_block_bytes]
    if fitting:
        if batch % 2 == 1:
            even = [t for t in fitting
                    if (batch * (H // t)) % 2 == 0 and batch * (H // t) >= 2]
            if even:
                return max(even)
        return max(fitting)
    # Nothing under the target: allow a relaxed (2x) budget and take the
    # largest fitting tile; otherwise take the smallest candidate (closest to
    # the budget from above) rather than blowing VMEM.
    relaxed = [t for t in candidates
               if out_block_bytes(t) <= 2 * target_block_bytes]
    if relaxed:
        return max(relaxed)
    return min(candidates)


def final_patch_expand_x4(x, w_expand, gamma, beta, input_resolution, dim,
                          eps=1e-5, row_tile=None):
    """x: (B, H*W, dim) -> (B, 16*H*W, dim), matching the PyTorch module."""
    H, W = input_resolution
    B, L, C = x.shape
    assert L == H * W, "input feature has wrong size"
    assert C == dim

    # Accept either the pre-transposed (dim, 16*dim) layout or PyTorch's
    # nn.Linear weight layout (16*dim, dim) — avoid the silent-transpose trap.
    if w_expand.shape == (16 * dim, dim):
        w_expand = w_expand.T
    assert w_expand.shape == (dim, 16 * dim), w_expand.shape

    out_dtype = x.dtype
    out_itemsize = jnp.dtype(out_dtype).itemsize
    in_itemsize = jnp.dtype(x.dtype).itemsize

    # Matmul operand dtype follows the activation dtype: a bf16 model gets a
    # bf16 weight (full-rate MXU, half the resident-weight VMEM / DMA); an f32
    # model keeps f32 numerics.  Statistics always stay f32.
    w_in = w_expand.astype(x.dtype)
    w_itemsize = jnp.dtype(w_in.dtype).itemsize

    # Generation-aware tiling: ~2 MiB output blocks on 64 MiB-class parts
    # (v7x), larger blocks on 128 MiB parts (v5e/v6e) to stay near the HBM
    # writeback roofline and amortize per-grid-step overhead.
    vmem_cap = _vmem_capacity_bytes()
    target_block_bytes = (2 << 20) if vmem_cap <= (64 << 20) else (6 << 20)

    th = row_tile if row_tile is not None else _choose_row_tile(
        H, W, dim, out_itemsize, B, target_block_bytes)
    assert H % th == 0
    assert th == H or (th * W) % 8 == 0
    n_row_tiles = H // th

    # Small constant matrices (f32): block-diagonal group-reduce, and the
    # gamma/beta-folded broadcast-back matrices.
    gidx = jnp.arange(16 * dim) // dim                                    # (16*dim,)
    g_reduce = (gidx[:, None] == jnp.arange(16)[None, :]).astype(
        jnp.float32) / float(dim)                                         # (16*dim, 16)
    gamma_t = jnp.tile(gamma.astype(jnp.float32), 16)                     # (16*dim,)
    beta_t = jnp.tile(beta.astype(jnp.float32), 16)                       # (16*dim,)
    g_scale = (jnp.arange(16)[:, None] == gidx[None, :]).astype(
        jnp.float32) * gamma_t[None, :]                                   # (16, 16*dim)
    g_shift = jnp.concatenate([g_scale, beta_t[None, :]], axis=0)         # (17, 16*dim)

    kernel = functools.partial(_expand_norm_shuffle_kernel,
                               th=th, W=W, dim=dim, eps=eps)

    # Advisory cost estimate (memory-bound: 16x write amplification).
    flops = (2 * B * L * dim * (16 * dim)            # expand matmul
             + 2 * 2 * B * L * (16 * dim) * 16       # two stat matmuls
             + 2 * B * L * (16 + 17) * (16 * dim))   # scale / shift broadcasts
    out_bytes = B * 16 * L * dim * out_itemsize
    bytes_accessed = (x.size * in_itemsize + w_in.size * w_itemsize + out_bytes)
    cost = pl.CostEstimate(flops=flops, transcendentals=B * L * 16,
                           bytes_accessed=bytes_accessed)

    # VMEM budget: double-buffered in/out blocks + (pipeline-allocated) small
    # constants + full-width f32 intermediates (y, y*y, scale, shift), with
    # 2x headroom.  Capped at 75% of physical VMEM for Mosaic scratch room.
    blk_bytes = (2 * th * W * dim * in_itemsize
                 + 2 * 16 * th * W * dim * out_itemsize
                 + 2 * (dim * 16 * dim * w_itemsize
                        + 16 * dim * 16 * 4
                        + 16 * 16 * dim * 4
                        + 17 * 16 * dim * 4))
    interm_bytes = 4 * th * W * 16 * dim * 4
    vmem_limit = int(min(0.75 * vmem_cap,
                         max(32 << 20, 2 * (blk_bytes + interm_bytes))))

    out = pl.pallas_call(
        kernel,
        out_shape=jax.ShapeDtypeStruct((B, H, 4, W, 4 * dim), out_dtype),
        grid_spec=pltpu.PrefetchScalarGridSpec(
            num_scalar_prefetch=0,
            grid=(B, n_row_tiles),
            in_specs=[
                pl.BlockSpec((1, th * W, dim), lambda b, i: (b, i, 0)),
                pl.BlockSpec((dim, 16 * dim), lambda b, i: (0, 0)),
                pl.BlockSpec((16 * dim, 16), lambda b, i: (0, 0)),
                pl.BlockSpec((16, 16 * dim), lambda b, i: (0, 0)),
                pl.BlockSpec((17, 16 * dim), lambda b, i: (0, 0)),
            ],
            out_specs=pl.BlockSpec((1, th, 4, W, 4 * dim),
                                   lambda b, i: (b, i, 0, 0, 0)),
        ),
        compiler_params=pltpu.CompilerParams(
            dimension_semantics=("parallel", "parallel"),
            vmem_limit_bytes=vmem_limit),
        cost_estimate=cost,
    )(x, w_in, g_reduce, g_scale, g_shift)

    # Free contiguous reshape: (B, H, 4, W, 4*dim) row-major flattens in
    # (b, h, p1, w, p2, c) order == 'b (h p1) (w p2) c'.  No transpose, no
    # extra HBM traffic.
    return out.reshape(B, 16 * H * W, dim)


def _reference(x, w_expand, gamma, beta, input_resolution, dim, eps=1e-5):
    """Pure-JAX reference mirroring the PyTorch forward exactly."""
    H, W = input_resolution
    B, L, C = x.shape
    y = jnp.einsum("blc,cd->bld", x, w_expand,
                   precision=jax.lax.Precision.HIGHEST)       # Linear, no bias
    y = y.reshape(B, H, W, 4, 4, dim)                         # (p1 p2 c)
    y = y.transpose(0, 1, 3, 2, 4, 5).reshape(B, 4 * H * 4 * W, dim)
    mean = y.mean(-1, keepdims=True)
    var = ((y - mean) ** 2).mean(-1, keepdims=True)
    y = (y - mean) / jnp.sqrt(var + eps)
    return y * gamma + beta


if __name__ == "__main__":
    B = 2
    H = W = 8
    DIM = 32
    key = jax.random.PRNGKey(0)
    kx, kw, kg, kb = jax.random.split(key, 4)

    x = jax.random.normal(kx, (B, H * W, DIM), dtype=jnp.float32)
    # nn.Linear(dim, 16*dim, bias=False): weight (16*dim, dim); we store its
    # transpose (dim, 16*dim) so the kernel does x @ W directly.
    w_expand = jax.random.normal(kw, (DIM, 16 * DIM), dtype=jnp.float32) * 0.05
    # nn.LayerNorm(dim) affine params (deterministic synthetic init).
    gamma = 1.0 + 0.1 * jax.random.normal(kg, (DIM,), dtype=jnp.float32)
    beta = 0.1 * jax.random.normal(kb, (DIM,), dtype=jnp.float32)

    ref = _reference(x, w_expand, gamma, beta, (H, W), DIM)

    # Default (auto-chosen, generation-aware) row tile.
    out = final_patch_expand_x4(x, w_expand, gamma, beta, (H, W), DIM)
    out = jax.block_until_ready(out)
    assert out.shape == (B, 16 * H * W, DIM), out.shape
    assert jnp.allclose(out, ref, atol=1e-3, rtol=1e-3), (
        float(jnp.max(jnp.abs(out - ref))))

    # Explicit smaller row tile to exercise the multi-step (B, H/TH) grid path.
    out_tiled = final_patch_expand_x4(x, w_expand, gamma, beta, (H, W), DIM,
                                      row_tile=2)
    out_tiled = jax.block_until_ready(out_tiled)
    assert jnp.allclose(out_tiled, ref, atol=1e-3, rtol=1e-3), (
        float(jnp.max(jnp.abs(out_tiled - ref))))

    print("KERNEL_OK")
</pallas_src>

<mosaic_0001>
module attributes {stable_mosaic.version = 11 : i64} {
  func.func @_expand_norm_shuffle_kernel(%arg0: i32, %arg1: i32, %arg2: memref<1x64x32xf32, #tpu.memory_space<vmem>>, %arg3: memref<32x512xf32, #tpu.memory_space<vmem>>, %arg4: memref<512x16xf32, #tpu.memory_space<vmem>>, %arg5: memref<16x512xf32, #tpu.memory_space<vmem>>, %arg6: memref<17x512xf32, #tpu.memory_space<vmem>>, %arg7: memref<1x8x4x8x128xf32, #tpu.memory_space<vmem>>) attributes {dimension_semantics = [#tpu.dimension_semantics<parallel>, #tpu.dimension_semantics<parallel>], iteration_bounds = array<i64: 2, 1>, scalar_prefetch = 0 : i64, scratch_operands = 0 : i64, tpu.core_type = #tpu.core_type<tc>, window_params = [{transform_indices = @transform_0, window_bounds = array<i64: 1, 64, 32>}, {pipeline_mode = #tpu.pipeline_mode<synchronous>, transform_indices = @transform_1, window_bounds = array<i64: 32, 512>}, {pipeline_mode = #tpu.pipeline_mode<synchronous>, transform_indices = @transform_2, window_bounds = array<i64: 512, 16>}, {pipeline_mode = #tpu.pipeline_mode<synchronous>, transform_indices = @transform_3, window_bounds = array<i64: 16, 512>}, {pipeline_mode = #tpu.pipeline_mode<synchronous>, transform_indices = @transform_4, window_bounds = array<i64: 17, 512>}, {transform_indices = @transform_5, window_bounds = array<i64: 1, 8, 4, 8, 128>}]} {
    %c0 = arith.constant 0 : index
    %c0_0 = arith.constant 0 : index
    %c0_1 = arith.constant 0 : index
    %0 = vector.load %arg2[%c0, %c0_0, %c0_1] : memref<1x64x32xf32, #tpu.memory_space<vmem>>, vector<1x64x32xf32>
    %1 = vector.shape_cast %0 : vector<1x64x32xf32> to vector<64x32xf32>
    %c0_2 = arith.constant 0 : index
    %c0_3 = arith.constant 0 : index
    %2 = vector.load %arg3[%c0_2, %c0_3] : memref<32x512xf32, #tpu.memory_space<vmem>>, vector<32x512xf32>
    %cst = arith.constant dense<0.000000e+00> : vector<64x512xf32>
    %3 = tpu.matmul %1, %2, %cst {dimension_numbers = #tpu.dot_dimension_numbers<[1], [0], [0], [1], [0, 0, 1, 1], [], []>} : vector<64x32xf32>, vector<32x512xf32>, vector<64x512xf32> -> vector<64x512xf32>
    %c0_4 = arith.constant 0 : index
    %c0_5 = arith.constant 0 : index
    %4 = vector.load %arg4[%c0_4, %c0_5] : memref<512x16xf32, #tpu.memory_space<vmem>>, vector<512x16xf32>
    %cst_6 = arith.constant dense<0.000000e+00> : vector<64x16xf32>
    %5 = tpu.matmul %3, %4, %cst_6 {dimension_numbers = #tpu.dot_dimension_numbers<[1], [0], [0], [1], [0, 0, 1, 1], [], []>} : vector<64x512xf32>, vector<512x16xf32>, vector<64x16xf32> -> vector<64x16xf32>
    %6 = arith.mulf %3, %3 : vector<64x512xf32>
    %c0_7 = arith.constant 0 : index
    %c0_8 = arith.constant 0 : index
    %7 = vector.load %arg4[%c0_7, %c0_8] : memref<512x16xf32, #tpu.memory_space<vmem>>, vector<512x16xf32>
    %cst_9 = arith.constant dense<0.000000e+00> : vector<64x16xf32>
    %8 = tpu.matmul %6, %7, %cst_9 {dimension_numbers = #tpu.dot_dimension_numbers<[1], [0], [0], [1], [0, 0, 1, 1], [], []>} : vector<64x512xf32>, vector<512x16xf32>, vector<64x16xf32> -> vector<64x16xf32>
    %9 = arith.mulf %5, %5 : vector<64x16xf32>
    %10 = arith.subf %8, %9 : vector<64x16xf32>
    %cst_10 = arith.constant 9.99999974E-6 : f32
    %11 = vector.broadcast %cst_10 : f32 to vector<64x16xf32>
    %12 = arith.addf %10, %11 : vector<64x16xf32>
    %13 = math.rsqrt %12 : vector<64x16xf32>
    %cst_11 = arith.constant 0.000000e+00 : f32
    %14 = vector.broadcast %cst_11 : f32 to vector<64x16xf32>
    %15 = arith.subf %14, %5 : vector<64x16xf32>
    %16 = arith.mulf %15, %13 : vector<64x16xf32>
    %cst_12 = arith.constant 1.000000e+00 : f32
    %17 = vector.broadcast %cst_12 : f32 to vector<64x1xf32>
    %18 = tpu.concatenate %16, %17 in 1 : vector<64x16xf32>, vector<64x1xf32> -> vector<64x17xf32>
    %c0_13 = arith.constant 0 : index
    %c0_14 = arith.constant 0 : index
    %19 = vector.load %arg5[%c0_13, %c0_14] : memref<16x512xf32, #tpu.memory_space<vmem>>, vector<16x512xf32>
    %cst_15 = arith.constant dense<0.000000e+00> : vector<64x512xf32>
    %20 = tpu.matmul %13, %19, %cst_15 {dimension_numbers = #tpu.dot_dimension_numbers<[1], [0], [0], [1], [0, 0, 1, 1], [], []>} : vector<64x16xf32>, vector<16x512xf32>, vector<64x512xf32> -> vector<64x512xf32>
    %c0_16 = arith.constant 0 : index
    %c0_17 = arith.constant 0 : index
    %21 = vector.load %arg6[%c0_16, %c0_17] : memref<17x512xf32, #tpu.memory_space<vmem>>, vector<17x512xf32>
    %cst_18 = arith.constant dense<0.000000e+00> : vector<64x512xf32>
    %22 = tpu.matmul %18, %21, %cst_18 {dimension_numbers = #tpu.dot_dimension_numbers<[1], [0], [0], [1], [0, 0, 1, 1], [], []>} : vector<64x17xf32>, vector<17x512xf32>, vector<64x512xf32> -> vector<64x512xf32>
    %23 = arith.mulf %3, %20 : vector<64x512xf32>
    %24 = arith.addf %23, %22 : vector<64x512xf32>
    %25 = vector.extract_strided_slice %24 {offsets = [0, 0], sizes = [64, 128], strides = [1, 1]} : vector<64x512xf32> to vector<64x128xf32>
    %26 = vector.shape_cast %25 : vector<64x128xf32> to vector<8x8x128xf32>
    %c0_19 = arith.constant 0 : index
    %c0_20 = arith.constant 0 : index
    %c0_21 = arith.constant 0 : index
    %c0_22 = arith.constant 0 : index
    %c0_23 = arith.constant 0 : index
    %27 = vector.load %arg7[%c0_19, %c0_20, %c0_21, %c0_22, %c0_23] : memref<1x8x4x8x128xf32, #tpu.memory_space<vmem>>, vector<1x8x1x8x128xf32>
    %28 = vector.shape_cast %27 : vector<1x8x1x8x128xf32> to vector<8x8x128xf32>
    %29 = vector.shape_cast %26 : vector<8x8x128xf32> to vector<1x8x1x8x128xf32>
    tpu.vector_store %arg7[%c0_19, %c0_20, %c0_21, %c0_22, %c0_23], %29 {strides = array<i32>} : memref<1x8x4x8x128xf32, #tpu.memory_space<vmem>>, vector<1x8x1x8x128xf32>,
    %30 = vector.extract_strided_slice %24 {offsets = [0, 128], sizes = [64, 128], strides = [1, 1]} : vector<64x512xf32> to vector<64x128xf32>
    %31 = vector.shape_cast %30 : vector<64x128xf32> to vector<8x8x128xf32>
    %c0_24 = arith.constant 0 : index
    %c0_25 = arith.constant 0 : index
    %c1 = arith.constant 1 : index
    %c0_26 = arith.constant 0 : index
    %c0_27 = arith.constant 0 : index
    %32 = vector.load %arg7[%c0_24, %c0_25, %c1, %c0_26, %c0_27] : memref<1x8x4x8x128xf32, #tpu.memory_space<vmem>>, vector<1x8x1x8x128xf32>
    %33 = vector.shape_cast %32 : vector<1x8x1x8x128xf32> to vector<8x8x128xf32>
    %34 = vector.shape_cast %31 : vector<8x8x128xf32> to vector<1x8x1x8x128xf32>
    tpu.vector_store %arg7[%c0_24, %c0_25, %c1, %c0_26, %c0_27], %34 {strides = array<i32>} : memref<1x8x4x8x128xf32, #tpu.memory_space<vmem>>, vector<1x8x1x8x128xf32>,
    %35 = vector.extract_strided_slice %24 {offsets = [0, 256], sizes = [64, 128], strides = [1, 1]} : vector<64x512xf32> to vector<64x128xf32>
    %36 = vector.shape_cast %35 : vector<64x128xf32> to vector<8x8x128xf32>
    %c0_28 = arith.constant 0 : index
    %c0_29 = arith.constant 0 : index
    %c2 = arith.constant 2 : index
    %c0_30 = arith.constant 0 : index
    %c0_31 = arith.constant 0 : index
    %37 = vector.load %arg7[%c0_28, %c0_29, %c2, %c0_30, %c0_31] : memref<1x8x4x8x128xf32, #tpu.memory_space<vmem>>, vector<1x8x1x8x128xf32>
    %38 = vector.shape_cast %37 : vector<1x8x1x8x128xf32> to vector<8x8x128xf32>
    %39 = vector.shape_cast %36 : vector<8x8x128xf32> to vector<1x8x1x8x128xf32>
    tpu.vector_store %arg7[%c0_28, %c0_29, %c2, %c0_30, %c0_31], %39 {strides = array<i32>} : memref<1x8x4x8x128xf32, #tpu.memory_space<vmem>>, vector<1x8x1x8x128xf32>,
    %40 = vector.extract_strided_slice %24 {offsets = [0, 384], sizes = [64, 128], strides = [1, 1]} : vector<64x512xf32> to vector<64x128xf32>
    %41 = vector.shape_cast %40 : vector<64x128xf32> to vector<8x8x128xf32>
    %c0_32 = arith.constant 0 : index
    %c0_33 = arith.constant 0 : index
    %c3 = arith.constant 3 : index
    %c0_34 = arith.constant 0 : index
    %c0_35 = arith.constant 0 : index
    %42 = vector.load %arg7[%c0_32, %c0_33, %c3, %c0_34, %c0_35] : memref<1x8x4x8x128xf32, #tpu.memory_space<vmem>>, vector<1x8x1x8x128xf32>
    %43 = vector.shape_cast %42 : vector<1x8x1x8x128xf32> to vector<8x8x128xf32>
    %44 = vector.shape_cast %41 : vector<8x8x128xf32> to vector<1x8x1x8x128xf32>
    tpu.vector_store %arg7[%c0_32, %c0_33, %c3, %c0_34, %c0_35], %44 {strides = array<i32>} : memref<1x8x4x8x128xf32, #tpu.memory_space<vmem>>, vector<1x8x1x8x128xf32>,
    return
  }
  func.func @transform_0(%arg0: i32, %arg1: i32) -> (i32, i32, i32) {
    %c0_i32 = arith.constant 0 : i32
    %c0_i32_0 = arith.constant 0 : i32
    return %arg0, %arg1, %c0_i32 : i32, i32, i32
  }
  func.func @transform_1(%arg0: i32, %arg1: i32) -> (i32, i32) {
    %c0_i32 = arith.constant 0 : i32
    %c0_i32_0 = arith.constant 0 : i32
    %c0_i32_1 = arith.constant 0 : i32
    return %c0_i32, %c0_i32_0 : i32, i32
  }
  func.func @transform_2(%arg0: i32, %arg1: i32) -> (i32, i32) {
    %c0_i32 = arith.constant 0 : i32
    %c0_i32_0 = arith.constant 0 : i32
    %c0_i32_1 = arith.constant 0 : i32
    return %c0_i32, %c0_i32_0 : i32, i32
  }
  func.func @transform_3(%arg0: i32, %arg1: i32) -> (i32, i32) {
    %c0_i32 = arith.constant 0 : i32
    %c0_i32_0 = arith.constant 0 : i32
    %c0_i32_1 = arith.constant 0 : i32
    return %c0_i32, %c0_i32_0 : i32, i32
  }
  func.func @transform_4(%arg0: i32, %arg1: i32) -> (i32, i32) {
    %c0_i32 = arith.constant 0 : i32
    %c0_i32_0 = arith.constant 0 : i32
    %c0_i32_1 = arith.constant 0 : i32
    return %c0_i32, %c0_i32_0 : i32, i32
  }
  func.func @transform_5(%arg0: i32, %arg1: i32) -> (i32, i32, i32, i32, i32) {
    %c0_i32 = arith.constant 0 : i32
    %c0_i32_0 = arith.constant 0 : i32
    %c0_i32_1 = arith.constant 0 : i32
    %c0_i32_2 = arith.constant 0 : i32
    return %arg0, %arg1, %c0_i32, %c0_i32_0, %c0_i32_1 : i32, i32, i32, i32, i32
  }
}

</mosaic_0001>

<bundles_post_ra>
// kernel: tpu_custom_call.1
= control target key start
LH: loop header
LB: loop body
LE: loop exit
PB: predicated region body
PF: predicated region fallthrough
CT: control target
= control target key end

     0   :  { %10 = vsyncpa [#allocation3], 0  ;;  %s3182_s0 = inlined_call_operand.vmem [shape: f32[2,64,32], index: 0, kind: input, shape index: {}]   ;;  %s3183_s1 = inlined_call_operand.vmem [shape: f32[32,512], index: 1, kind: input, shape index: {}]   ;;  %s3184_s2 = inlined_call_operand.vmem [shape: f32[512,16], index: 2, kind: input, shape index: {}]   ;;  %s3185_s3 = inlined_call_operand.vmem [shape: f32[16,512], index: 3, kind: input, shape index: {}]   ;;  %s3186_s4 = inlined_call_operand.vmem [shape: f32[17,512], index: 4, kind: input, shape index: {}]   ;;  %s3187_s5 = inlined_call_operand.hbm [shape: f32[2,8,4,8,128], index: 5, kind: output, shape index: {}]  }
   0x1   :  { %12 = vsyncpa [#allocation3 + $0x1], 0  ;;  %s1951_s18 = smov 0   ;;  %s1953_s19 = smov 0  }
   0x2   :  { %s1955_s20 = smov 0   ;;  %s1957_s21 = smov 0  }
   0x3   :  { %s1959_s22 = smov 0   ;;  %s1961_s23 = smov 0  }
   0x4 LB: > { %s1627_s24 = sadd.s32 4294967295, %s1917_s23   ;;  %s1628_s25 = sadd.s32 4294967294, %s1917_s23   ;;  %s1917_s23 = sphi %s1961_s23, %s18_s23   ;;  %s1913_s22 = sphi %s1959_s22, %s3248_s22   ;;  %s1909_s21 = sphi %s1957_s21, %s3247_s21   ;;  %s1905_s20 = sphi %s1955_s20, %s3246_s20   ;;  %s1901_s19 = sphi %s1953_s19, %s3245_s19   ;;  %s1897_s18 = sphi %s1951_s18, %s3244_s18  }
   0x5   : > { %s30_s26 = sadd.s32 1, %s1913_s22  ;;  %s151_s27 = sadd.s32 1, %s1905_s20 }
   0x6   : > { %p32_p0 = scmp.ge.s32.totalorder %s30_s26, 2  ;;  %p161_p1 = scmp.ne.s32.totalorder %s1905_s20, %s1901_s19 }
   0x7   : > { %p162_p2 = scmp.eq.s32.totalorder %s1627_s24, 1  ;;  %p167_p3 = scmp.ne.s32.totalorder %s1901_s19, %s1897_s18 }
   0x8   : > { %s3250_s26 = smov (%p32_p0, %s30_s26), 0  ;;  %p168_p5 = scmp.eq.s32.totalorder %s1628_s25, 1 }
   0x9   : > { %p1991_p4 = por %p162_p2, %p161_p1  ;;  %s146_s29 = ssub.s32 %s1913_s22, %s3250_s26 }
   0xa   : > { %p1631_p6 = scmp.ge.s32.totalorder %s1917_s23, 1  ;;  %p149_p7 = scmp.eq.s32.totalorder %s146_s29, 0 }
   0xb   : > { %p1998_p8 = por %p168_p5, %p167_p3  ;;  %p211_p9 = scmp.lt.s32.totalorder %s1917_s23, 3 }
   0xc   : > { %s2004_s6 = scalar_select %p149_p7, %s1905_s20, %s151_s27  }
   0xd   : > { %p212_p10 = pnand %p1631_p6, %p211_p9 }
   0xf   : > { %215 = sbr.rel (%p212_p10) target bundleno = 644 (0x284), region = 40 }
  0x14   : > { %v274_v0 = vld [vmem:[%s3183_s1 + $0x60] sm:$0xff]  ;;  %v275_v1 = vld [vmem:[%s3183_s1 + $0x68] sm:$0xff]  ;;  %v276_v2 = vld [vmem:[%s3183_s1 + $0x70] sm:$0xff]  ;;  %p244_p11 = scmp.lt.s32.totalorder %s1909_s21, 1  ;;  %vm278_vm0 = vcmask 261120   ;;  %vm1253_vm1 = vcmask 1040384  }
  0x15   : > { %315 = vmatpush.msra.mxu0 %v274_v0  ;;  %356 = vmatpush.msra.mxu1 %v275_v1  ;;  %v277_v3 = vld [vmem:[%s3183_s1 + $0x78] sm:$0xff]  ;;  %v270_v4 = vld [vmem:[%s3183_s1 + $0x40] sm:$0xff]  ;;  %v271_v5 = vld [vmem:[%s3183_s1 + $0x48] sm:$0xff]  ;;  %vm1011_vm4 = vcmask 130048   ;;  %s240_s8 = sand.u32 1, %s1901_s19   ;;  %s1765_s12 = sshll.u32 %s1909_s21, 8 }
  0x16   : > { %397 = vmatpush.msra.mxu2 %v276_v2  ;;  %438 = vmatpush.msra.mxu3 %v277_v3  ;;  %v272_v6 = vld [vmem:[%s3183_s1 + $0x50] sm:$0xff]  ;;  %v273_v7 = vld [vmem:[%s3183_s1 + $0x58] sm:$0xff]  ;;  %v266_v8 = vld [vmem:[%s3183_s1 + $0x20] sm:$0xff]  ;;  %s245_s10 = scalar_select %p244_p11, %s1909_s21, 1 }
  0x17   : > { %316 = vmatpush.msra.mxu0 %v270_v4  ;;  %357 = vmatpush.msra.mxu1 %v271_v5  ;;  %v267_v9 = vld [vmem:[%s3183_s1 + $0x28] sm:$0xff]  ;;  %v268_v10 = vld [vmem:[%s3183_s1 + $0x30] sm:$0xff]  ;;  %v269_v11 = vld [vmem:[%s3183_s1 + $0x38] sm:$0xff]  ;;  %s1632_s9 = sshll.u32 %s240_s8, 8  ;;  %s1544_s15 = scalar_lea.hbm %s3187_s5, %s1765_s12 }
  0x18   : > { %398 = vmatpush.msra.mxu2 %v272_v6  ;;  %439 = vmatpush.msra.mxu3 %v273_v7  ;;  %v262_v12 = vld [vmem:[%s3183_s1] sm:$0xff]  ;;  %v263_v13 = vld [vmem:[%s3183_s1 + $0x8] sm:$0xff]  ;;  %s1764_s29 = sshll.u32 %s245_s10, 6  ;;  %v264_v14 = vld [vmem:[%s3183_s1 + $0x10] sm:$0xff]  ;;  %s3057_s11 = scalar_lea.vmem [#allocation2], %s1632_s9 }
  0x19   : > { %317 = vmatpush.msra.mxu0 %v266_v8  ;;  %358 = vmatpush.msra.mxu1 %v267_v9  ;;  %v265_v15 = vld [vmem:[%s3183_s1 + $0x18] sm:$0xff]  ;;  %s2059_s14 = scalar_lea.vmem %s3182_s0, %s1764_s29  ;;  %v2106_v24 = vld [vmem:[%s3184_s2 + $0x170] sm:$0xff]  ;;  %v2128_v28 = vld [vmem:[%s3184_s2 + $0x168] sm:$0xff]  ;;  %s1547_s16 = sshll.u32 %s1544_s15, 4  ;;  %s1548_s16 = int_to_ptr.hbm [resolvable:$true] %s1547_s16 }
  0x1a   : > { %399 = vmatpush.msra.mxu2 %v268_v10  ;;  %440 = vmatpush.msra.mxu3 %v269_v11  ;;  %v254_v16 = vld [vmem:[%s2059_s14] sm:$0xff]  ;;  %v255_v17 = vld [vmem:[%s2059_s14 + $0x8] sm:$0xff]  ;;  %v256_v18 = vld [vmem:[%s2059_s14 + $0x10] sm:$0xff]  ;;  %s1530_s21 = scalar_lea.sflag [#allocation3], %s240_s8  ;;  %s1853_s17 = sshra.s32 %s1548_s16, 4  ;;  %s1854_s17 = int_to_ptr.hbm [resolvable:$true] %s1853_s17 }
  0x1b   : > { %318 = vmatpush.msra.mxu0 %v262_v12  ;;  %359 = vmatpush.msra.mxu1 %v263_v13  ;;  %v257_v19 = vld [vmem:[%s2059_s14 + $0x18] sm:$0xff]  ;;  %v2111_v25 = vld [vmem:[%s3184_s2 + $0x1f0] sm:$0xff]  ;;  %v2135_v29 = vld [vmem:[%s3184_s2 + $0x1e8] sm:$0xff]  ;;  %s1855_s24 = scalar_lea.hbm %s1854_s17, 256  ;;  %s1859_s29 = scalar_lea.hbm %s3187_s5, 512 }
  0x1c   : > { %400 = vmatpush.msra.mxu2 %v264_v14  ;;  %441 = vmatpush.msra.mxu3 %v265_v15  ;;  %v2084_v20 = vld [vmem:[%s3184_s2 + $0x178] sm:$0xff]  ;;  %v2118_v26 = vld [vmem:[%s3184_s2 + $0x70] sm:$0xff]  ;;  %v2140_v30 = vld [vmem:[%s3184_s2 + $0x68] sm:$0xff]  ;;  %p1856_p12 = scmp.ne.s32.totalorder %s1854_s17, %s1855_s24  ;;  %p1860_p1 = scmp.lt.s32.totalorder %s1854_s17, %s3187_s5 }
  0x1d   : > { %1635 = vmatmul.msk.f32.vlgmr.msra.gmra.mxu0 %vm278_vm0, %v254_v16  ;;  %1643 = vmatmul.msk.f32.vlgmr.msra.gmra.mxu1 %vm278_vm0, %v254_v16  ;;  %v2089_v21 = vld [vmem:[%s3184_s2 + $0x1f8] sm:$0xff]  ;;  %v2123_v27 = vld [vmem:[%s3184_s2 + $0xf0] sm:$0xff]  ;;  %v2145_v31 = vld [vmem:[%s3184_s2 + $0xe8] sm:$0xff]  ;;  %p1861_p2 = scmp.lt.s32.totalorder %s1859_s29, %s1855_s24 }
  0x1e   : > { %1651 = vmatmul.msk.f32.vlgmr.msra.gmra.mxu2 %vm278_vm0, %v254_v16  ;;  %1659 = vmatmul.msk.f32.vlgmr.msra.gmra.mxu3 %vm278_vm0, %v254_v16  ;;  %v2094_v22 = vld [vmem:[%s3184_s2 + $0x78] sm:$0xff]  ;;  %v258_v32 = vld [vmem:[%s2059_s14 + $0x20] sm:$0xff]  ;;  %v2205_v41 = vld [vmem:[%s3184_s2 + $0x150] sm:$0xff]  ;;  %p1857_p13 = pnand %p1856_p12, %p1991_p4 }
  0x1f   : > { %613 = vmatpush.msrb.mxu2 %v2084_v20  ;;  %654 = vmatpush.msrb.mxu3 %v2089_v21  ;;  %v2101_v23 = vld [vmem:[%s3184_s2 + $0xf8] sm:$0xff]  ;;  %v2157_v33 = vld [vmem:[%s3184_s2 + $0x160] sm:$0xff]  ;;  %v2210_v42 = vld [vmem:[%s3184_s2 + $0x1d0] sm:$0xff]  ;;  %p1862_p3 = por %p1861_p2, %p1860_p1 }
  0x20   : > { %531 = vmatpush.msrb.mxu0 %v2094_v22  ;;  %572 = vmatpush.msrb.mxu1 %v2101_v23  ;;  %v2162_v34 = vld [vmem:[%s3184_s2 + $0x1e0] sm:$0xff]  ;;  %v2181_v37 = vld [vmem:[%s3184_s2 + $0x158] sm:$0xff]  ;;  %v2217_v43 = vld [vmem:[%s3184_s2 + $0x50] sm:$0xff]  ;;  %p1858_p0 = pneg %p1857_p13 }
  0x21   : > { %614 = vmatpush.msrb.mxu2 %v2106_v24  ;;  %655 = vmatpush.msrb.mxu3 %v2111_v25  ;;  %v2169_v35 = vld [vmem:[%s3184_s2 + $0x60] sm:$0xff]  ;;  %v2186_v38 = vld [vmem:[%s3184_s2 + $0x1d8] sm:$0xff]  ;;  %v2222_v44 = vld [vmem:[%s3184_s2 + $0xd0] sm:$0xff] }
  0x22   : > { %532 = vmatpush.msrb.mxu0 %v2118_v26  ;;  %573 = vmatpush.msrb.mxu1 %v2123_v27  ;;  %v2174_v36 = vld [vmem:[%s3184_s2 + $0xe0] sm:$0xff]  ;;  %v2193_v39 = vld [vmem:[%s3184_s2 + $0x58] sm:$0xff]  ;;  %v259_v45 = vld [vmem:[%s2059_s14 + $0x28] sm:$0xff]  ;;  %p1863_p5 = pnand %p1862_p3, %p1858_p0 }
  0x23   : > { %615 = vmatpush.msrb.mxu2 %v2128_v28  ;;  %656 = vmatpush.msrb.mxu3 %v2135_v29  ;;  %v2198_v40 = vld [vmem:[%s3184_s2 + $0xd8] sm:$0xff]  ;;  %v2234_v46 = vld [vmem:[%s3184_s2 + $0x148] sm:$0xff]  ;;  %v2258_v50 = vld [vmem:[%s3184_s2 + $0x140] sm:$0xff] }
  0x24   : > { %533 = vmatpush.msrb.mxu0 %v2140_v30  ;;  %574 = vmatpush.msrb.mxu1 %v2145_v31  ;;  %v2239_v47 = vld [vmem:[%s3184_s2 + $0x1c8] sm:$0xff]  ;;  %v2263_v51 = vld [vmem:[%s3184_s2 + $0x1c0] sm:$0xff]  ;;  %v2282_v54 = vld [vmem:[%s3184_s2 + $0x138] sm:$0xff] }
  0x25   : > { %1636 = vmatmul.msk.f32.gmra.mxu0 %vm278_vm0, %v255_v17  ;;  %1644 = vmatmul.msk.f32.gmra.mxu1 %vm278_vm0, %v255_v17  ;;  %v2246_v48 = vld [vmem:[%s3184_s2 + $0x48] sm:$0xff]  ;;  %v2270_v52 = vld [vmem:[%s3184_s2 + $0x40] sm:$0xff]  ;;  %v2287_v55 = vld [vmem:[%s3184_s2 + $0x1b8] sm:$0xff] }
  0x26   : > { %1652 = vmatmul.msk.f32.gmra.mxu2 %vm278_vm0, %v255_v17  ;;  %1660 = vmatmul.msk.f32.gmra.mxu3 %vm278_vm0, %v255_v17  ;;  %v2251_v49 = vld [vmem:[%s3184_s2 + $0xc8] sm:$0xff]  ;;  %v2275_v53 = vld [vmem:[%s3184_s2 + $0xc0] sm:$0xff]  ;;  %v2294_v56 = vld [vmem:[%s3184_s2 + $0x38] sm:$0xff] }
  0x27   : > { %616 = vmatpush.msrb.mxu2 %v2157_v33  ;;  %657 = vmatpush.msrb.mxu3 %v2162_v34  ;;  %v2299_v57 = vld [vmem:[%s3184_s2 + $0xb8] sm:$0xff]  ;;  %v260_v58 = vld [vmem:[%s2059_s14 + $0x30] sm:$0xff]  ;;  %v2335_v63 = vld [vmem:[%s3184_s2 + $0x128] sm:$0xff] }
  0x28   : > { %534 = vmatpush.msrb.mxu0 %v2169_v35  ;;  %575 = vmatpush.msrb.mxu1 %v2174_v36  ;;  %v2311_v59 = vld [vmem:[%s3184_s2 + $0x130] sm:$0xff]  ;;  %v2340_v0 = vld [vmem:[%s3184_s2 + $0x1a8] sm:$0xff]  ;;  %v2359_v3 = vld [vmem:[%s3184_s2 + $0x120] sm:$0xff] }
  0x29   : > { %617 = vmatpush.msrb.mxu2 %v2181_v37  ;;  %658 = vmatpush.msrb.mxu3 %v2186_v38  ;;  %v2316_v60 = vld [vmem:[%s3184_s2 + $0x1b0] sm:$0xff]  ;;  %v2347_v1 = vld [vmem:[%s3184_s2 + $0x28] sm:$0xff]  ;;  %v2364_v4 = vld [vmem:[%s3184_s2 + $0x1a0] sm:$0xff] }
  0x2a   : > { %535 = vmatpush.msrb.mxu0 %v2193_v39  ;;  %576 = vmatpush.msrb.mxu1 %v2198_v40  ;;  %v2323_v61 = vld [vmem:[%s3184_s2 + $0x30] sm:$0xff]  ;;  %v2352_v2 = vld [vmem:[%s3184_s2 + $0xa8] sm:$0xff]  ;;  %v2371_v5 = vld [vmem:[%s3184_s2 + $0x20] sm:$0xff] }
  0x2b   : > { %618 = vmatpush.msrb.mxu2 %v2205_v41  ;;  %659 = vmatpush.msrb.mxu3 %v2210_v42  ;;  %v2328_v62 = vld [vmem:[%s3184_s2 + $0xb0] sm:$0xff]  ;;  %v2376_v6 = vld [vmem:[%s3184_s2 + $0xa0] sm:$0xff]  ;;  %v261_v7 = vld [vmem:[%s2059_s14 + $0x38] sm:$0xff]  ;;  %s1545_s14 = sshll.u32 %s3057_s11, 4  ;;  %s1546_s14 = int_to_ptr.vmem [resolvable:$true] %s1545_s14 }
  0x2c   : > { %536 = vmatpush.msrb.mxu0 %v2217_v43  ;;  %577 = vmatpush.msrb.mxu1 %v2222_v44  ;;  %v2388_v8 = vld [vmem:[%s3184_s2 + $0x118] sm:$0xff]  ;;  %v2412_v12 = vld [vmem:[%s3184_s2 + $0x110] sm:$0xff]  ;;  %v2436_v16 = vld [vmem:[%s3184_s2 + $0x108] sm:$0xff] }
  0x2d   : > { %1637 = vmatmul.msk.f32.gmra.mxu0 %vm278_vm0, %v256_v18  ;;  %1645 = vmatmul.msk.f32.gmra.mxu1 %vm278_vm0, %v256_v18  ;;  %v2393_v9 = vld [vmem:[%s3184_s2 + $0x198] sm:$0xff]  ;;  %v2417_v13 = vld [vmem:[%s3184_s2 + $0x190] sm:$0xff]  ;;  %v2443_v17 = vld [vmem:[%s3184_s2 + $0x8] sm:$0xff] }
  0x2e   : > { %1653 = vmatmul.msk.f32.gmra.mxu2 %vm278_vm0, %v256_v18  ;;  %1661 = vmatmul.msk.f32.gmra.mxu3 %vm278_vm0, %v256_v18  ;;  %v2400_v10 = vld [vmem:[%s3184_s2 + $0x18] sm:$0xff]  ;;  %v2424_v14 = vld [vmem:[%s3184_s2 + $0x10] sm:$0xff]  ;;  %v2448_v18 = vld [vmem:[%s3184_s2 + $0x88] sm:$0xff] }
  0x2f   : > { %619 = vmatpush.msrb.mxu2 %v2234_v46  ;;  %660 = vmatpush.msrb.mxu3 %v2239_v47  ;;  %v2405_v11 = vld [vmem:[%s3184_s2 + $0x98] sm:$0xff]  ;;  %v2429_v15 = vld [vmem:[%s3184_s2 + $0x90] sm:$0xff] }
  0x30   : > { %537 = vmatpush.msrb.mxu0 %v2246_v48  ;;  %578 = vmatpush.msrb.mxu1 %v2251_v49 }
  0x31   : > { %620 = vmatpush.msrb.mxu2 %v2258_v50  ;;  %661 = vmatpush.msrb.mxu3 %v2263_v51 }
  0x32   : > { %538 = vmatpush.msrb.mxu0 %v2270_v52  ;;  %579 = vmatpush.msrb.mxu1 %v2275_v53 }
  0x33   : > { %621 = vmatpush.msrb.mxu2 %v2282_v54  ;;  %662 = vmatpush.msrb.mxu3 %v2287_v55 }
  0x34   : > { %539 = vmatpush.msrb.mxu0 %v2294_v56  ;;  %580 = vmatpush.msrb.mxu1 %v2299_v57 }
  0x35   : > { %1638 = vmatmul.msk.f32.gmra.mxu0 %vm278_vm0, %v257_v19  ;;  %1646 = vmatmul.msk.f32.gmra.mxu1 %vm278_vm0, %v257_v19 }
  0x36   : > { %1654 = vmatmul.msk.f32.gmra.mxu2 %vm278_vm0, %v257_v19  ;;  %1662 = vmatmul.msk.f32.gmra.mxu3 %vm278_vm0, %v257_v19  ;;  %v2458_v19 = vld [vmem:[%s3184_s2] sm:$0xff] }
  0x37   : > { %622 = vmatpush.msrb.mxu2 %v2311_v59  ;;  %663 = vmatpush.msrb.mxu3 %v2316_v60 }
  0x38   : > { %540 = vmatpush.msrb.mxu0 %v2323_v61  ;;  %581 = vmatpush.msrb.mxu1 %v2328_v62 }
  0x39   : > { %623 = vmatpush.msrb.mxu2 %v2335_v63  ;;  %664 = vmatpush.msrb.mxu3 %v2340_v0 }
  0x3a   : > { %541 = vmatpush.msrb.mxu0 %v2347_v1  ;;  %582 = vmatpush.msrb.mxu1 %v2352_v2 }
  0x3b   : > { %624 = vmatpush.msrb.mxu2 %v2359_v3  ;;  %665 = vmatpush.msrb.mxu3 %v2364_v4 }
  0x3c   : > { %542 = vmatpush.msrb.mxu0 %v2371_v5  ;;  %583 = vmatpush.msrb.mxu1 %v2376_v6 }
  0x3d   : > { %1639 = vmatmul.msk.f32.gmra.mxu0 %vm278_vm0, %v258_v32  ;;  %1647 = vmatmul.msk.f32.gmra.mxu1 %vm278_vm0, %v258_v32 }
  0x3e   : > { %1655 = vmatmul.msk.f32.gmra.mxu2 %vm278_vm0, %v258_v32  ;;  %1663 = vmatmul.msk.f32.gmra.mxu3 %vm278_vm0, %v258_v32  ;;  %v2463_v32 = vld [vmem:[%s3184_s2 + $0x80] sm:$0xff] }
  0x3f   : > { %625 = vmatpush.msrb.mxu2 %v2388_v8  ;;  %666 = vmatpush.msrb.mxu3 %v2393_v9 }
  0x40   : > { %543 = vmatpush.msrb.mxu0 %v2400_v10  ;;  %584 = vmatpush.msrb.mxu1 %v2405_v11 }
  0x41   : > { %626 = vmatpush.msrb.mxu2 %v2412_v12  ;;  %667 = vmatpush.msrb.mxu3 %v2417_v13 }
  0x42   : > { %544 = vmatpush.msrb.mxu0 %v2424_v14  ;;  %585 = vmatpush.msrb.mxu1 %v2429_v15 }
  0x43   : > { %627 = vmatpush.msrb.mxu2 %v2436_v16 }
  0x44   : > { %545 = vmatpush.msrb.mxu0 %v2443_v17  ;;  %586 = vmatpush.msrb.mxu1 %v2448_v18 }
  0x45   : > { %1640 = vmatmul.msk.f32.gmra.mxu0 %vm278_vm0, %v259_v45  ;;  %1648 = vmatmul.msk.f32.gmra.mxu1 %vm278_vm0, %v259_v45 }
  0x46   : > { %1656 = vmatmul.msk.f32.gmra.mxu2 %vm278_vm0, %v259_v45  ;;  %1664 = vmatmul.msk.f32.gmra.mxu3 %vm278_vm0, %v259_v45  ;;  %v2470_v45 = vld [vmem:[%s3184_s2 + $0x188] sm:$0xff] }
  0x47   : > { %546 = vmatpush.msrb.mxu0 %v2458_v19  ;;  %587 = vmatpush.msrb.mxu1 %v2463_v32 }
  0x48   : > { %668 = vmatpush.msrb.mxu3 %v2470_v45 }
  0x49   : > { %727 = vmatpush.msra.mxu0 %v2094_v22  ;;  %768 = vmatpush.msra.mxu1 %v2101_v23 }
  0x4b   : > { %728 = vmatpush.msra.mxu0 %v2118_v26  ;;  %769 = vmatpush.msra.mxu1 %v2123_v27 }
  0x4d   : > { %1641 = vmatmul.msk.f32.gmra.mxu0 %vm278_vm0, %v260_v58  ;;  %1649 = vmatmul.msk.f32.gmra.mxu1 %vm278_vm0, %v260_v58 }
  0x4e   : > { %1657 = vmatmul.msk.f32.gmra.mxu2 %vm278_vm0, %v260_v58  ;;  %1665 = vmatmul.msk.f32.gmra.mxu3 %vm278_vm0, %v260_v58  ;;  %v2475_v58 = vld [vmem:[%s3184_s2 + $0x100] sm:$0xff] }
  0x4f   : > { %628 = vmatpush.msrb.mxu2 %v2475_v58  ;;  %729 = vmatpush.msra.mxu0 %v2140_v30 }
  0x50   : > { %770 = vmatpush.msra.mxu1 %v2145_v31 }
  0x51   : > { %809 = vmatpush.msra.mxu2 %v2084_v20  ;;  %730 = vmatpush.msra.mxu0 %v2169_v35 }
  0x52   : > { %771 = vmatpush.msra.mxu1 %v2174_v36 }
  0x53   : > { %810 = vmatpush.msra.mxu2 %v2106_v24  ;;  %731 = vmatpush.msra.mxu0 %v2193_v39 }
  0x54   : > { %772 = vmatpush.msra.mxu1 %v2198_v40 }
  0x55   : > { %1642 = vmatmul.msk.f32.gmra.mxu0 %vm278_vm0, %v261_v7  ;;  %1650 = vmatmul.msk.f32.gmra.mxu1 %vm278_vm0, %v261_v7 }
  0x56   : > { %1658 = vmatmul.msk.f32.gmra.mxu2 %vm278_vm0, %v261_v7  ;;  %1666 = vmatmul.msk.f32.gmra.mxu3 %vm278_vm0, %v261_v7  ;;  %v2480_v7 = vld [vmem:[%s3184_s2 + $0x180] sm:$0xff] }
  0x57   : > { %669 = vmatpush.msrb.mxu3 %v2480_v7  ;;  %811 = vmatpush.msra.mxu2 %v2128_v28 }
  0x58   : > { %732 = vmatpush.msra.mxu0 %v2217_v43  ;;  %773 = vmatpush.msra.mxu1 %v2222_v44 }
  0x59   : > { %850 = vmatpush.msra.mxu3 %v2089_v21  ;;  %812 = vmatpush.msra.mxu2 %v2157_v33 }
  0x5a   : > { %733 = vmatpush.msra.mxu0 %v2246_v48  ;;  %774 = vmatpush.msra.mxu1 %v2251_v49 }
  0x5b   : > { %851 = vmatpush.msra.mxu3 %v2111_v25  ;;  %813 = vmatpush.msra.mxu2 %v2181_v37 }
  0x5c   : > { %734 = vmatpush.msra.mxu0 %v2270_v52  ;;  %775 = vmatpush.msra.mxu1 %v2275_v53 }
  0x5d   : > { %852 = vmatpush.msra.mxu3 %v2135_v29  ;;  %814 = vmatpush.msra.mxu2 %v2205_v41 }
  0x5e   : > { %735 = vmatpush.msra.mxu0 %v2294_v56  ;;  %776 = vmatpush.msra.mxu1 %v2299_v57 }
  0x5f   : > { %853 = vmatpush.msra.mxu3 %v2162_v34  ;;  %815 = vmatpush.msra.mxu2 %v2234_v46 }
  0x60   : > { %736 = vmatpush.msra.mxu0 %v2323_v61  ;;  %777 = vmatpush.msra.mxu1 %v2328_v62 }
  0x61   : > { %854 = vmatpush.msra.mxu3 %v2186_v38  ;;  %816 = vmatpush.msra.mxu2 %v2258_v50 }
  0x62   : > { %737 = vmatpush.msra.mxu0 %v2347_v1  ;;  %778 = vmatpush.msra.mxu1 %v2352_v2 }
  0x63   : > { %855 = vmatpush.msra.mxu3 %v2210_v42  ;;  %817 = vmatpush.msra.mxu2 %v2282_v54 }
  0x64   : > { %738 = vmatpush.msra.mxu0 %v2371_v5  ;;  %779 = vmatpush.msra.mxu1 %v2376_v6 }
  0x65   : > { %856 = vmatpush.msra.mxu3 %v2239_v47  ;;  %818 = vmatpush.msra.mxu2 %v2311_v59 }
  0x66   : > { %739 = vmatpush.msra.mxu0 %v2400_v10  ;;  %780 = vmatpush.msra.mxu1 %v2405_v11 }
  0x67   : > { %857 = vmatpush.msra.mxu3 %v2263_v51  ;;  %819 = vmatpush.msra.mxu2 %v2335_v63 }
  0x68   : > { %740 = vmatpush.msra.mxu0 %v2424_v14  ;;  %781 = vmatpush.msra.mxu1 %v2429_v15 }
  0x69   : > { %858 = vmatpush.msra.mxu3 %v2287_v55  ;;  %820 = vmatpush.msra.mxu2 %v2359_v3 }
  0x6a   : > { %741 = vmatpush.msra.mxu0 %v2443_v17  ;;  %782 = vmatpush.msra.mxu1 %v2448_v18 }
  0x6b   : > { %859 = vmatpush.msra.mxu3 %v2316_v60  ;;  %821 = vmatpush.msra.mxu2 %v2388_v8 }
  0x6c   : > { %742 = vmatpush.msra.mxu0 %v2458_v19  ;;  %783 = vmatpush.msra.mxu1 %v2463_v32 }
  0x6d   : > { %860 = vmatpush.msra.mxu3 %v2340_v0  ;;  %822 = vmatpush.msra.mxu2 %v2412_v12 }
  0x6f   : > { %861 = vmatpush.msra.mxu3 %v2364_v4  ;;  %823 = vmatpush.msra.mxu2 %v2436_v16 }
  0x71   : > { %862 = vmatpush.msra.mxu3 %v2393_v9  ;;  %824 = vmatpush.msra.mxu2 %v2475_v58 }
  0x73   : > { %863 = vmatpush.msra.mxu3 %v2417_v13 }
  0x75   : > { %864 = vmatpush.msra.mxu3 %v2470_v45 }
  0x77   : > { %865 = vmatpush.msra.mxu3 %v2480_v7 }
  0x9a   : > { %v2542_v20 = vpop.f32.mrf.mxu0  ;;  %v2544_v21 = vpop.f32.mrf.mxu1 }
  0x9b   : > { %547 = vmatmul.f32.vlgmr.msrb.gmra.mxu0 %v2542_v20  ;;  %588 = vmatmul.f32.vlgmr.msrb.gmra.mxu1 %v2544_v21  ;;  %v695_v52 = vmul.f32 %v2542_v20, %v2542_v20  ;;  %v696_v53 = vmul.f32 %v2544_v21, %v2544_v21 }
  0xa1   : > { %v2555_v22 = vpop.f32.mrf.mxu2  ;;  %v2557_v23 = vpop.f32.mrf.mxu3 }
  0xa2   : > { %629 = vmatmul.f32.vlgmr.msrb.gmra.mxu2 %v2555_v22  ;;  %670 = vmatmul.f32.vlgmr.msrb.gmra.mxu3 %v2557_v23  ;;  %v2561_v24 = vpop.f32.mrf.mxu0  ;;  %v2563_v25 = vpop.f32.mrf.mxu1  ;;  %v697_v56 = vmul.f32 %v2555_v22, %v2555_v22  ;;  %v698_v57 = vmul.f32 %v2557_v23, %v2557_v23 }
  0xa3   : > { %550 = vmatmul.f32.gmra.mxu0 %v2561_v24  ;;  %591 = vmatmul.f32.gmra.mxu1 %v2563_v25  ;;  %v699_v59 = vmul.f32 %v2561_v24, %v2561_v24  ;;  %v700_v60 = vmul.f32 %v2563_v25, %v2563_v25 }
  0xa9   : > { %v2567_v26 = vpop.f32.mrf.mxu2  ;;  %v2569_v27 = vpop.f32.mrf.mxu3 }
  0xaa   : > { %632 = vmatmul.f32.gmra.mxu2 %v2567_v26  ;;  %673 = vmatmul.f32.gmra.mxu3 %v2569_v27  ;;  %v2573_v28 = vpop.f32.mrf.mxu0  ;;  %v2575_v29 = vpop.f32.mrf.mxu1  ;;  %v701_v61 = vmul.f32 %v2567_v26, %v2567_v26  ;;  %v702_v62 = vmul.f32 %v2569_v27, %v2569_v27 }
  0xab   : > { %553 = vmatmul.f32.gmra.mxu0 %v2573_v28  ;;  %594 = vmatmul.f32.gmra.mxu1 %v2575_v29  ;;  %v703_v63 = vmul.f32 %v2573_v28, %v2573_v28  ;;  %v704_v0 = vmul.f32 %v2575_v29, %v2575_v29 }
  0xb1   : > { %v2579_v30 = vpop.f32.mrf.mxu2  ;;  %v2581_v31 = vpop.f32.mrf.mxu3 }
  0xb2   : > { %635 = vmatmul.f32.gmra.mxu2 %v2579_v30  ;;  %676 = vmatmul.f32.gmra.mxu3 %v2581_v31  ;;  %v2585_v33 = vpop.f32.mrf.mxu0  ;;  %v2587_v34 = vpop.f32.mrf.mxu1  ;;  %v705_v1 = vmul.f32 %v2579_v30, %v2579_v30  ;;  %v706_v2 = vmul.f32 %v2581_v31, %v2581_v31 }
  0xb3   : > { %556 = vmatmul.f32.gmra.mxu0 %v2585_v33  ;;  %597 = vmatmul.f32.gmra.mxu1 %v2587_v34  ;;  %v707_v3 = vmul.f32 %v2585_v33, %v2585_v33  ;;  %v708_v4 = vmul.f32 %v2587_v34, %v2587_v34 }
  0xb9   : > { %v2591_v35 = vpop.f32.mrf.mxu2  ;;  %v2593_v36 = vpop.f32.mrf.mxu3 }
  0xba   : > { %3208 = vst [vmem:[#allocation5_spill] sm:$0xff] %v2591_v35  ;;  %638 = vmatmul.f32.gmra.mxu2 %v2591_v35  ;;  %679 = vmatmul.f32.gmra.mxu3 %v2593_v36  ;;  %v2597_v37 = vpop.f32.mrf.mxu0  ;;  %v2599_v38 = vpop.f32.mrf.mxu1  ;;  %v709_v5 = vmul.f32 %v2591_v35, %v2591_v35  ;;  %v710_v6 = vmul.f32 %v2593_v36, %v2593_v36 }
  0xbb   : > { %3209 = vst [vmem:[#allocation6_spill] sm:$0xff] %v2593_v36  ;;  %559 = vmatmul.f32.gmra.mxu0 %v2597_v37  ;;  %600 = vmatmul.f32.gmra.mxu1 %v2599_v38  ;;  %v711_v8 = vmul.f32 %v2597_v37, %v2597_v37  ;;  %v712_v9 = vmul.f32 %v2599_v38, %v2599_v38 }
  0xbc   : > { %3210 = vst [vmem:[#allocation7_spill] sm:$0xff] %v2597_v37 }
  0xbd   : > { %3211 = vst [vmem:[#allocation8_spill] sm:$0xff] %v2599_v38 }
  0xc1   : > { %v2603_v39 = vpop.f32.mrf.mxu2  ;;  %v2605_v40 = vpop.f32.mrf.mxu3 }
  0xc2   : > { %3212 = vst [vmem:[#allocation9_spill] sm:$0xff] %v2603_v39  ;;  %641 = vmatmul.f32.gmra.mxu2 %v2603_v39  ;;  %682 = vmatmul.f32.gmra.mxu3 %v2605_v40  ;;  %v2609_v41 = vpop.f32.mrf.mxu0  ;;  %v2611_v42 = vpop.f32.mrf.mxu1  ;;  %v713_v10 = vmul.f32 %v2603_v39, %v2603_v39  ;;  %v714_v11 = vmul.f32 %v2605_v40, %v2605_v40 }
  0xc3   : > { %3213 = vst [vmem:[#allocation10_spill] sm:$0xff] %v2605_v40  ;;  %562 = vmatmul.f32.gmra.mxu0 %v2609_v41  ;;  %603 = vmatmul.f32.gmra.mxu1 %v2611_v42  ;;  %v715_v12 = vmul.f32 %v2609_v41, %v2609_v41  ;;  %v716_v13 = vmul.f32 %v2611_v42, %v2611_v42 }
  0xc4   : > { %3214 = vst [vmem:[#allocation11_spill] sm:$0xff] %v2609_v41 }
  0xc5   : > { %3215 = vst [vmem:[#allocation12_spill] sm:$0xff] %v2611_v42 }
  0xc9   : > { %v2615_v43 = vpop.f32.mrf.mxu2  ;;  %v2617_v44 = vpop.f32.mrf.mxu3 }
  0xca   : > { %3216 = vst [vmem:[#allocation13_spill] sm:$0xff] %v2615_v43  ;;  %644 = vmatmul.f32.gmra.mxu2 %v2615_v43  ;;  %685 = vmatmul.f32.gmra.mxu3 %v2617_v44  ;;  %v2621_v46 = vpop.f32.mrf.mxu0  ;;  %v2623_v47 = vpop.f32.mrf.mxu1  ;;  %v717_v14 = vmul.f32 %v2615_v43, %v2615_v43  ;;  %v718_v15 = vmul.f32 %v2617_v44, %v2617_v44 }
  0xcb   : > { %3217 = vst [vmem:[#allocation14_spill] sm:$0xff] %v2617_v44  ;;  %565 = vmatmul.f32.gmra.mxu0 %v2621_v46  ;;  %606 = vmatmul.f32.gmra.mxu1 %v2623_v47  ;;  %v719_v16 = vmul.f32 %v2621_v46, %v2621_v46  ;;  %v720_v17 = vmul.f32 %v2623_v47, %v2623_v47 }
  0xcc   : > { %3218 = vst [vmem:[#allocation15_spill] sm:$0xff] %v2621_v46 }
  0xcd   : > { %3219 = vst [vmem:[#allocation16_spill] sm:$0xff] %v2623_v47 }
  0xd1   : > { %v2627_v48 = vpop.f32.mrf.mxu2  ;;  %v2629_v49 = vpop.f32.mrf.mxu3 }
  0xd2   : > { %3220 = vst [vmem:[#allocation17_spill] sm:$0xff] %v2627_v48  ;;  %647 = vmatmul.f32.gmra.mxu2 %v2627_v48  ;;  %688 = vmatmul.f32.gmra.mxu3 %v2629_v49  ;;  %v2633_v50 = vpop.f32.mrf.mxu0  ;;  %v2635_v51 = vpop.f32.mrf.mxu1  ;;  %v721_v18 = vmul.f32 %v2627_v48, %v2627_v48  ;;  %v722_v19 = vmul.f32 %v2629_v49, %v2629_v49 }
  0xd3   : > { %3221 = vst [vmem:[#allocation18_spill] sm:$0xff] %v2629_v49  ;;  %568 = vmatmul.f32.gmra.mxu0 %v2633_v50  ;;  %609 = vmatmul.f32.gmra.mxu1 %v2635_v51  ;;  %v723_v32 = vmul.f32 %v2633_v50, %v2633_v50  ;;  %v724_v45 = vmul.f32 %v2635_v51, %v2635_v51  ;;  %v1021_v49 = vld [vmem:[%s3185_s3 + $0x8] sm:$0xff] }
  0xd4   : > { %3222 = vst [vmem:[#allocation19_spill] sm:$0xff] %v2633_v50  ;;  %v1020_v50 = vld [vmem:[%s3185_s3] sm:$0xff] }
  0xd5   : > { %3223 = vst [vmem:[#allocation20_spill] sm:$0xff] %v2635_v51 }
  0xd9   : > { %v2643_v54 = vpop.f32.mrf.mxu2  ;;  %v2645_v55 = vpop.f32.mrf.mxu3 }
  0xda   : > { %3224 = vst [vmem:[#allocation21_spill] sm:$0xff] %v2643_v54  ;;  %650 = vmatmul.f32.gmra.mxu2 %v2643_v54  ;;  %691 = vmatmul.f32.gmra.mxu3 %v2645_v55 }
  0xdb   : > { %3225 = vst [vmem:[#allocation22_spill] sm:$0xff] %v2645_v55  ;;  %743 = vmatmul.f32.vlgmr.msra.gmra.mxu0 %v695_v52  ;;  %784 = vmatmul.f32.vlgmr.msra.gmra.mxu1 %v696_v53  ;;  %v725_v52 = vmul.f32 %v2643_v54, %v2643_v54  ;;  %v726_v53 = vmul.f32 %v2645_v55, %v2645_v55 }
  0xe2   : > { %825 = vmatmul.f32.vlgmr.msra.gmra.mxu2 %v697_v56  ;;  %866 = vmatmul.f32.vlgmr.msra.gmra.mxu3 %v698_v57 }
  0xe3   : > { %746 = vmatmul.f32.gmra.mxu0 %v699_v59  ;;  %787 = vmatmul.f32.gmra.mxu1 %v700_v60  ;;  %v1026_v59 = vld [vmem:[%s3185_s3 + $0x30] sm:$0xff]  ;;  %v1027_v60 = vld [vmem:[%s3185_s3 + $0x38] sm:$0xff] }
  0xe4   : > { %1148 = vmatpush.msrb.mxu2 %v1026_v59  ;;  %1189 = vmatpush.msrb.mxu3 %v1027_v60 }
  0xea   : > { %828 = vmatmul.f32.gmra.mxu2 %v701_v61  ;;  %869 = vmatmul.f32.gmra.mxu3 %v702_v62 }
  0xeb   : > { %749 = vmatmul.f32.gmra.mxu0 %v703_v63  ;;  %790 = vmatmul.f32.gmra.mxu1 %v704_v0 }
  0xf2   : > { %831 = vmatmul.f32.gmra.mxu2 %v705_v1  ;;  %872 = vmatmul.f32.gmra.mxu3 %v706_v2  ;;  %v1024_v1 = vld [vmem:[%s3185_s3 + $0x20] sm:$0xff]  ;;  %v1025_v2 = vld [vmem:[%s3185_s3 + $0x28] sm:$0xff] }
  0xf3   : > { %752 = vmatmul.f32.gmra.mxu0 %v707_v3  ;;  %793 = vmatmul.f32.gmra.mxu1 %v708_v4 }
  0xf4   : > { %1066 = vmatpush.msrb.mxu0 %v1024_v1  ;;  %1107 = vmatpush.msrb.mxu1 %v1025_v2 }
  0xf6   : > { %1067 = vmatpush.msrb.mxu0 %v1020_v50  ;;  %1108 = vmatpush.msrb.mxu1 %v1021_v49 }
  0xfa   : > { %834 = vmatmul.f32.gmra.mxu2 %v709_v5  ;;  %875 = vmatmul.f32.gmra.mxu3 %v710_v6 }
  0xfb   : > { %755 = vmatmul.f32.gmra.mxu0 %v711_v8  ;;  %796 = vmatmul.f32.gmra.mxu1 %v712_v9 }
 0x102   : > { %837 = vmatmul.f32.gmra.mxu2 %v713_v10  ;;  %878 = vmatmul.f32.gmra.mxu3 %v714_v11 }
 0x103   : > { %758 = vmatmul.f32.gmra.mxu0 %v715_v12  ;;  %799 = vmatmul.f32.gmra.mxu1 %v716_v13 }
 0x10a   : > { %840 = vmatmul.f32.gmra.mxu2 %v717_v14  ;;  %881 = vmatmul.f32.gmra.mxu3 %v718_v15 }
 0x10b   : > { %761 = vmatmul.f32.gmra.mxu0 %v719_v16  ;;  %802 = vmatmul.f32.gmra.mxu1 %v720_v17  ;;  %v1022_v16 = vld [vmem:[%s3185_s3 + $0x10] sm:$0xff]  ;;  %v1023_v17 = vld [vmem:[%s3185_s3 + $0x18] sm:$0xff] }
 0x10c   : > { %1149 = vmatpush.msrb.mxu2 %v1022_v16  ;;  %1190 = vmatpush.msrb.mxu3 %v1023_v17 }
 0x112   : > { %843 = vmatmul.f32.gmra.mxu2 %v721_v18  ;;  %884 = vmatmul.f32.gmra.mxu3 %v722_v19 }
 0x113   : > { %764 = vmatmul.f32.gmra.mxu0 %v723_v32  ;;  %805 = vmatmul.f32.gmra.mxu1 %v724_v45 }
 0x118   : > { %v548_v58 = vpop.f32.mrf.mxu0  ;;  %v589_v7 = vpop.f32.mrf.mxu1 }
 0x119   : > { %v590_v55 = vadd.f32 %v589_v7, %v548_v58 }
 0x11a   : > { %846 = vmatmul.f32.gmra.mxu2 %v725_v52  ;;  %887 = vmatmul.f32.gmra.mxu3 %v726_v53 }
 0x120   : > { %v551_v56 = vpop.f32.mrf.mxu0  ;;  %v592_v57 = vpop.f32.mrf.mxu1 }
 0x121   : > { %v593_v44 = vadd.f32 %v592_v57, %v551_v56 }
 0x125   : > { %v630_v61 = vpop.f32.mrf.mxu2  ;;  %v671_v62 = vpop.f32.mrf.mxu3 }
 0x126   : > { %v631_v48 = vadd.f32 %v630_v61, %v590_v55 }
 0x128   : > { %v554_v63 = vpop.f32.mrf.mxu0  ;;  %v595_v0 = vpop.f32.mrf.mxu1  ;;  %v2775_v43 = vadd.f32 %v671_v62, %v631_v48 }
 0x129   : > { %v596_v50 = vadd.f32 %v595_v0, %v554_v63 }
 0x12a   : > { %v891_v40 = vmul.f32 %v2775_v43, %v2775_v43 }
 0x12d   : > { %v633_v3 = vpop.f32.mrf.mxu2  ;;  %v674_v4 = vpop.f32.mrf.mxu3 }
 0x12e   : > { %v634_v39 = vadd.f32 %v633_v3, %v593_v44 }
 0x130   : > { %v2721_v5 = vpop.f32.mrf.mxu0  ;;  %v2723_v6 = vpop.f32.mrf.mxu1  ;;  %v2779_v49 = vadd.f32 %v674_v4, %v634_v39 }
 0x132   : > { %v892_v62 = vmul.f32 %v2779_v49, %v2779_v49 }
 0x135   : > { %v636_v8 = vpop.f32.mrf.mxu2  ;;  %v2725_v9 = vpop.f32.mrf.mxu3 }
 0x138   : > { %v2727_v10 = vpop.f32.mrf.mxu0  ;;  %v2729_v11 = vpop.f32.mrf.mxu1 }
 0x13d   : > { %v2731_v12 = vpop.f32.mrf.mxu2  ;;  %v2733_v13 = vpop.f32.mrf.mxu3 }
 0x140   : > { %v2735_v14 = vpop.f32.mrf.mxu0  ;;  %v2737_v15 = vpop.f32.mrf.mxu1 }
 0x145   : > { %v2745_v18 = vpop.f32.mrf.mxu2  ;;  %v2747_v19 = vpop.f32.mrf.mxu3 }
 0x148   : > { %v2749_v32 = vpop.f32.mrf.mxu0  ;;  %v2751_v45 = vpop.f32.mrf.mxu1 }
 0x14d   : > { %v2753_v52 = vpop.f32.mrf.mxu2  ;;  %v2755_v53 = vpop.f32.mrf.mxu3 }
 0x150   : > { %v2757_v59 = vpop.f32.mrf.mxu0  ;;  %v2759_v60 = vpop.f32.mrf.mxu1 }
 0x155   : > { %v2761_v1 = vpop.f32.mrf.mxu2  ;;  %v2763_v2 = vpop.f32.mrf.mxu3 }
 0x158   : > { %v744_v16 = vpop.f32.mrf.mxu0  ;;  %v785_v17 = vpop.f32.mrf.mxu1 }
 0x159   : > { %v786_v58 = vadd.f32 %v785_v17, %v744_v16  ;;  %v637_v16 = vadd.f32 %v636_v8, %v596_v50 }
 0x15d   : > { %v2765_v54 = vpop.f32.mrf.mxu2  ;;  %v2767_v51 = vpop.f32.mrf.mxu3 }
 0x160   : > { %v747_v47 = vpop.f32.mrf.mxu0  ;;  %v788_v46 = vpop.f32.mrf.mxu1 }
 0x161   : > { %v789_v55 = vadd.f32 %v788_v46, %v747_v47 }
 0x165   : > { %v826_v7 = vpop.f32.mrf.mxu2  ;;  %v867_v42 = vpop.f32.mrf.mxu3 }
 0x166   : > { %v827_v41 = vadd.f32 %v826_v7, %v786_v58 }
 0x168   : > { %v868_v38 = vadd.f32 %v867_v42, %v827_v41  ;;  %v750_v37 = vpop.f32.mrf.mxu0  ;;  %v791_v36 = vpop.f32.mrf.mxu1  ;;  %v2792_v42 = vadd.f32 %v2725_v9, %v637_v16 }
 0x169   : > { %v792_v46 = vadd.f32 %v791_v36, %v750_v37 }
 0x16a   : > { %v899_v35 = vsub.f32 %v868_v38, %v891_v40  ;;  %v1226_v38 = vld [vmem:[%s3186_s4 + $0x50] sm:$0x1]  ;;  %v599_v40 = vadd.f32 %v2723_v6, %v2721_v5  ;;  %v893_v5 = vmul.f32 %v2792_v42, %v2792_v42 }
 0x16b   : > { %1717 = vmatpush.msk.msra.mxu2 %vm1253_vm1, %v1226_v38 }
 0x16c   : > { %v907_v61 = vadd.f32 1e-05, %v899_v35  ;;  %v1227_v35 = vld [vmem:[%s3186_s4 + $0x58] sm:$0x1]  ;;  %v640_v6 = vadd.f32 %v2731_v12, %v599_v40 }
 0x16d   : > { %v829_v56 = vpop.f32.mrf.mxu2  ;;  %v870_v48 = vpop.f32.mrf.mxu3  ;;  %1726 = vmatpush.msk.msra.mxu3 %vm1253_vm1, %v1227_v35 }
 0x16e   : > { %1823 = vrsqrt.f32 %v907_v61  ;;  %v830_v57 = vadd.f32 %v829_v56, %v789_v55  ;;  %v602_v55 = vadd.f32 %v2729_v11, %v2727_v10  ;;  %v2811_v12 = vadd.f32 %v2733_v13, %v640_v6 }
 0x16f   : > { %vm921_vm3 = vweird.f32 %v907_v61 }
 0x170   : > { %v871_v17 = vadd.f32 %v870_v48, %v830_v57  ;;  %v753_v58 = vpop.f32.mrf.mxu0  ;;  %v794_v44 = vpop.f32.mrf.mxu1  ;;  %v1224_v48 = vld [vmem:[%s3186_s4 + $0x40] sm:$0x1]  ;;  %v1225_v57 = vld [vmem:[%s3186_s4 + $0x48] sm:$0x1]  ;;  %v894_v40 = vmul.f32 %v2811_v12, %v2811_v12 }
 0x171   : > { %v795_v16 = vadd.f32 %v794_v44, %v753_v58  ;;  %1699 = vmatpush.msk.msra.mxu0 %vm1253_vm1, %v1224_v48  ;;  %1708 = vmatpush.msk.msra.mxu1 %vm1253_vm1, %v1225_v57  ;;  %v643_v58 = vadd.f32 %v2745_v18, %v602_v55 }
 0x172   : > { %v900_v41 = vsub.f32 %v871_v17, %v892_v62 }
 0x174   : > { %v1824_v39 = vpop.eup %1823  ;;  %v2794_v47 = vadd.f32 1e-05, %v900_v41 }
 0x175   : > { %v916_v63 = vmul.f32 %v1824_v39, %v907_v61  ;;  %v832_v0 = vpop.f32.mrf.mxu2  ;;  %v873_v3 = vpop.f32.mrf.mxu3  ;;  %vm922_vm2 = vweird.f32 %v1824_v39 }
 0x176   : > { %1825 = vrsqrt.f32 %v2794_v47  ;;  %v833_v4 = vadd.f32 %v832_v0, %v792_v46  ;;  %vm923_vm5 = vmor %vm921_vm3, %vm922_vm2  ;;  %vm931_vm7 = vweird.f32 %v2794_v47 }
 0x177   : > { %v917_v8 = vmul.f32 %v1824_v39, %v916_v63 }
 0x178   : > { %v874_v9 = vadd.f32 %v873_v3, %v833_v4  ;;  %v756_v7 = vpop.f32.mrf.mxu0  ;;  %v797_v50 = vpop.f32.mrf.mxu1  ;;  %v605_v3 = vadd.f32 %v2737_v15, %v2735_v14 }
 0x179   : > { %v918_v36 = vmul.f32 0.5, %v917_v8  ;;  %v798_v4 = vadd.f32 %v797_v50, %v756_v7 }
 0x17a   : > { %v901_v37 = vsub.f32 %v874_v9, %v893_v5  ;;  %v646_v50 = vadd.f32 %v2753_v52, %v605_v3  ;;  %v1222_v52 = vld [vmem:[%s3186_s4 + $0x30] sm:$0xff] }
 0x17b   : > { %v919_v56 = vsub.f32 1.5, %v918_v36  ;;  %1362 = vmatpush.msra.mxu2 %v1222_v52 }
 0x17c   : > { %v1826_v62 = vpop.eup %1825  ;;  %v2813_v17 = vadd.f32 1e-05, %v901_v37 }
 0x17d   : > { %v920_v10 = vmul.f32 %v1824_v39, %v919_v56  ;;  %v926_v11 = vmul.f32 %v1826_v62, %v2794_v47  ;;  %v835_v41 = vpop.f32.mrf.mxu2  ;;  %v876_v38 = vpop.f32.mrf.mxu3  ;;  %vm932_vm6 = vweird.f32 %v1826_v62 }
 0x17e   : > { %1827 = vrsqrt.f32 %v2813_v17  ;;  %v836_v13 = vadd.f32 %v835_v41, %v795_v16  ;;  %vm933_vm8 = vmor %vm931_vm7, %vm932_vm6  ;;  %v1220_v41 = vld [vmem:[%s3186_s4 + $0x20] sm:$0xff]  ;;  %vm941_vm10 = vweird.f32 %v2813_v17 }
 0x17f   : > { %v927_v44 = vmul.f32 %v1826_v62, %v926_v11  ;;  %v2821_v35 = vsel %vm923_vm5, %v1824_v39, %v920_v10  ;;  %v2834_v39 = vadd.f32 %v2747_v19, %v643_v58  ;;  %v996_v19 = vsub.f32 0.0, %v2779_v49  ;;  %v1223_v11 = vld [vmem:[%s3186_s4 + $0x38] sm:$0xff]  ;;  %1280 = vmatpush.msra.mxu0 %v1220_v41 }
 0x180   : > { %v877_v46 = vadd.f32 %v876_v38, %v836_v13  ;;  %1667 = vmatmul.msk.f32.vlgmr.msrb.gmra.mxu0 %vm1011_vm4, %v2821_v35  ;;  %1675 = vmatmul.msk.f32.vlgmr.msrb.gmra.mxu1 %vm1011_vm4, %v2821_v35  ;;  %v759_v5 = vpop.f32.mrf.mxu0  ;;  %v800_v6 = vpop.f32.mrf.mxu1  ;;  %v2867_v13 = vadd.f32 %v2755_v53, %v646_v50  ;;  %v997_v53 = vsub.f32 0.0, %v2792_v42 }
 0x181   : > { %v928_v61 = vmul.f32 0.5, %v927_v44  ;;  %1683 = vmatmul.msk.f32.vlgmr.msrb.gmra.mxu2 %vm1011_vm4, %v2821_v35  ;;  %1691 = vmatmul.msk.f32.vlgmr.msrb.gmra.mxu3 %vm1011_vm4, %v2821_v35  ;;  %v895_v14 = vmul.f32 %v2834_v39, %v2834_v39  ;;  %v801_v58 = vadd.f32 %v800_v6, %v759_v5 }
 0x182   : > { %v902_v18 = vsub.f32 %v877_v46, %v894_v40  ;;  %1403 = vmatpush.msra.mxu3 %v1223_v11  ;;  %v896_v6 = vmul.f32 %v2867_v13, %v2867_v13 }
 0x183   : > { %v929_v63 = vsub.f32 1.5, %v928_v61 }
 0x184   : > { %v1828_v0 = vpop.eup %1827  ;;  %v2838_v8 = vadd.f32 1e-05, %v902_v18 }
 0x185   : > { %v936_v9 = vmul.f32 %v1828_v0, %v2813_v17  ;;  %v838_v36 = vpop.f32.mrf.mxu2  ;;  %v879_v37 = vpop.f32.mrf.mxu3  ;;  %v930_v55 = vmul.f32 %v1826_v62, %v929_v63  ;;  %vm942_vm9 = vweird.f32 %v1828_v0 }
 0x186   : > { %1829 = vrsqrt.f32 %v2838_v8  ;;  %v839_v56 = vadd.f32 %v838_v36, %v798_v4  ;;  %vm943_vm11 = vmor %vm941_vm10, %vm942_vm9  ;;  %vm951_vm13 = vweird.f32 %v2838_v8 }
 0x187   : > { %v937_v15 = vmul.f32 %v1828_v0, %v936_v9  ;;  %v934_v7 = vsel %vm933_vm8, %v1826_v62, %v930_v55  ;;  %v608_v62 = vadd.f32 %v2751_v45, %v2749_v32  ;;  %v1221_v45 = vld [vmem:[%s3186_s4 + $0x28] sm:$0xff] }
 0x188   : > { %v880_v47 = vadd.f32 %v879_v37, %v839_v56  ;;  %1668 = vmatmul.msk.f32.gmra.mxu0 %vm1011_vm4, %v934_v7  ;;  %1676 = vmatmul.msk.f32.gmra.mxu1 %vm1011_vm4, %v934_v7  ;;  %v1004_v48 = vmul.f32 %v996_v19, %v934_v7  ;;  %v762_v4 = vpop.f32.mrf.mxu0  ;;  %v803_v5 = vpop.f32.mrf.mxu1  ;;  %v1218_v19 = vld [vmem:[%s3186_s4 + $0x10] sm:$0xff]  ;;  %v1219_v56 = vld [vmem:[%s3186_s4 + $0x18] sm:$0xff] }
 0x189   : > { %v938_v57 = vmul.f32 0.5, %v937_v15  ;;  %1684 = vmatmul.msk.f32.gmra.mxu2 %vm1011_vm4, %v934_v7  ;;  %1692 = vmatmul.msk.f32.gmra.mxu3 %vm1011_vm4, %v934_v7  ;;  %v649_v63 = vadd.f32 %v2761_v1, %v608_v62  ;;  %v611_v7 = vadd.f32 %v2759_v60, %v2757_v59  ;;  %v998_v59 = vsub.f32 0.0, %v2811_v12 }
 0x18a   : > { %v903_v49 = vsub.f32 %v880_v47, %v895_v14  ;;  %v2853_v16 = vsel %vm1011_vm4, %v1004_v48, 1.0  ;;  %1321 = vmatpush.msra.mxu1 %v1221_v45  ;;  %v1216_v14 = vld [vmem:[%s3186_s4] sm:$0xff]  ;;  %1363 = vmatpush.msra.mxu2 %v1218_v19  ;;  %v1217_v47 = vld [vmem:[%s3186_s4 + $0x8] sm:$0xff] }
 0x18b   : > { %v939_v10 = vsub.f32 1.5, %v938_v57  ;;  %1404 = vmatpush.msra.mxu3 %v1219_v56  ;;  %1281 = vmatpush.msra.mxu0 %v1216_v14 }
 0x18c   : > { %v1830_v38 = vpop.eup %1829  ;;  %v2869_v32 = vadd.f32 1e-05, %v903_v49  ;;  %1322 = vmatpush.msra.mxu1 %v1217_v47 }
 0x18d   : > { %v946_v44 = vmul.f32 %v1830_v38, %v2838_v8  ;;  %v841_v40 = vpop.f32.mrf.mxu2  ;;  %v882_v46 = vpop.f32.mrf.mxu3  ;;  %v940_v61 = vmul.f32 %v1828_v0, %v939_v10  ;;  %vm952_vm12 = vweird.f32 %v1830_v38  ;;  %v652_v8 = vadd.f32 %v2765_v54, %v611_v7 }
 0x18e   : > { %1831 = vrsqrt.f32 %v2869_v32  ;;  %v842_v18 = vadd.f32 %v841_v40, %v801_v58  ;;  %vm953_vm14 = vmor %vm951_vm13, %vm952_vm12  ;;  %vm961_vm0 = vweird.f32 %v2869_v32  ;;  %vm1228_vm12 = vcmask 138240  }
 0x18f   : > { %v947_v3 = vmul.f32 %v1830_v38, %v946_v44  ;;  %v944_v17 = vsel %vm943_vm11, %v1828_v0, %v940_v61  ;;  %v2890_v0 = vadd.f32 %v2763_v2, %v649_v63  ;;  %v804_v2 = vadd.f32 %v803_v5, %v762_v4 }
 0x190   : > { %v883_v9 = vadd.f32 %v882_v46, %v842_v18  ;;  %1669 = vmatmul.msk.f32.gmra.mxu0 %vm1011_vm4, %v944_v17  ;;  %1677 = vmatmul.msk.f32.gmra.mxu1 %vm1011_vm4, %v944_v17  ;;  %v1005_v42 = vmul.f32 %v997_v53, %v944_v17  ;;  %v765_v12 = vpop.f32.mrf.mxu0  ;;  %v806_v44 = vpop.f32.mrf.mxu1  ;;  %v2924_v61 = vadd.f32 %v2767_v51, %v652_v8  ;;  %v999_v5 = vsub.f32 0.0, %v2834_v39 }
 0x191   : > { %v948_v36 = vmul.f32 0.5, %v947_v3  ;;  %1685 = vmatmul.msk.f32.gmra.mxu2 %vm1011_vm4, %v944_v17  ;;  %1693 = vmatmul.msk.f32.gmra.mxu3 %vm1011_vm4, %v944_v17  ;;  %v897_v10 = vmul.f32 %v2890_v0, %v2890_v0  ;;  %v807_v53 = vadd.f32 %v806_v44, %v765_v12 }
 0x192   : > { %v904_v37 = vsub.f32 %v883_v9, %v896_v6  ;;  %v2887_v1 = vsel %vm1011_vm4, %v1005_v42, 1.0  ;;  %v898_v51 = vmul.f32 %v2924_v61, %v2924_v61 }
 0x193   : > { %v949_v55 = vsub.f32 1.5, %v948_v36 }
 0x194   : > { %v1832_v15 = vpop.eup %1831  ;;  %v2903_v50 = vadd.f32 1e-05, %v904_v37 }
 0x195   : > { %v956_v48 = vmul.f32 %v1832_v15, %v2869_v32  ;;  %v844_v57 = vpop.f32.mrf.mxu2  ;;  %v885_v49 = vpop.f32.mrf.mxu3  ;;  %v950_v62 = vmul.f32 %v1830_v38, %v949_v55  ;;  %vm962_vm15 = vweird.f32 %v1832_v15 }
 0x196   : > { %1833 = vrsqrt.f32 %v2903_v50  ;;  %v845_v60 = vadd.f32 %v844_v57, %v804_v2  ;;  %vm963_vm1 = vmor %vm961_vm0, %vm962_vm15  ;;  %vm971_vm3 = vweird.f32 %v2903_v50  ;;  %v1000_v2 = vsub.f32 0.0, %v2867_v13 }
 0x197   : > { %v957_v52 = vmul.f32 %v1832_v15, %v956_v48  ;;  %v954_v11 = vsel %vm953_vm14, %v1830_v38, %v950_v62 }
 0x198   : > { %v886_v41 = vadd.f32 %v885_v49, %v845_v60  ;;  %1670 = vmatmul.msk.f32.gmra.mxu0 %vm1011_vm4, %v954_v11  ;;  %1678 = vmatmul.msk.f32.gmra.mxu1 %vm1011_vm4, %v954_v11  ;;  %v1006_v58 = vmul.f32 %v998_v59, %v954_v11 }
 0x199   : > { %v958_v45 = vmul.f32 0.5, %v957_v52  ;;  %1686 = vmatmul.msk.f32.gmra.mxu2 %vm1011_vm4, %v954_v11  ;;  %1694 = vmatmul.msk.f32.gmra.mxu3 %vm1011_vm4, %v954_v11 }
 0x19a   : > { %v905_v40 = vsub.f32 %v886_v41, %v897_v10  ;;  %v2921_v46 = vsel %vm1011_vm4, %v1006_v58, 1.0  ;;  %v1001_v10 = vsub.f32 0.0, %v2890_v0  ;;  %v1002_v0 = vsub.f32 0.0, %v2924_v61 }
 0x19b   : > { %v959_v38 = vsub.f32 1.5, %v958_v45 }
 0x19c   : > { %v1834_v54 = vpop.eup %1833  ;;  %v913_v18 = vadd.f32 1e-05, %v905_v40 }
 0x19d   : > { %v966_v63 = vmul.f32 %v1834_v54, %v2903_v50  ;;  %v847_v3 = vpop.f32.mrf.mxu2  ;;  %v960_v4 = vmul.f32 %v1832_v15, %v959_v38  ;;  %v888_v9 = vpop.f32.mrf.mxu3  ;;  %vm972_vm2 = vweird.f32 %v1834_v54  ;;  %v995_v38 = vsub.f32 0.0, %v2775_v43 }
 0x19e   : > { %1835 = vrsqrt.f32 %v913_v18  ;;  %v848_v17 = vadd.f32 %v847_v3, %v807_v53  ;;  %vm973_vm5 = vmor %vm971_vm3, %vm972_vm2  ;;  %vm981_vm7 = vweird.f32 %v913_v18 }
 0x19f   : > { %v967_v6 = vmul.f32 %v1834_v54, %v966_v63  ;;  %v964_v42 = vsel %vm963_vm1, %v1832_v15, %v960_v4  ;;  %v1003_v53 = vmul.f32 %v995_v38, %v2821_v35 }
 0x1a0   : > { %v889_v36 = vadd.f32 %v888_v9, %v848_v17  ;;  %1671 = vmatmul.msk.f32.gmra.mxu0 %vm1011_vm4, %v964_v42  ;;  %1679 = vmatmul.msk.f32.gmra.mxu1 %vm1011_vm4, %v964_v42  ;;  %v1007_v32 = vmul.f32 %v999_v5, %v964_v42 }
 0x1a1   : > { %v968_v37 = vmul.f32 0.5, %v967_v6  ;;  %1687 = vmatmul.msk.f32.gmra.mxu2 %vm1011_vm4, %v964_v42  ;;  %1695 = vmatmul.msk.f32.gmra.mxu3 %vm1011_vm4, %v964_v42  ;;  %v1012_v61 = vsel %vm1011_vm4, %v1003_v53, 1.0 }
 0x1a2   : > { %v906_v39 = vsub.f32 %v889_v36, %v898_v51  ;;  %v2936_v55 = vsel %vm1011_vm4, %v1007_v32, 1.0 }
 0x1a3   : > { %v969_v19 = vsub.f32 1.5, %v968_v37 }
 0x1a4   : > { %v1836_v56 = vpop.eup %1835  ;;  %v914_v14 = vadd.f32 1e-05, %v906_v39 }
 0x1a5   : > { %v976_v15 = vmul.f32 %v1836_v56, %v913_v18  ;;  %v970_v7 = vmul.f32 %v1834_v54, %v969_v19  ;;  %vm982_vm6 = vweird.f32 %v1836_v56 }
 0x1a6   : > { %1837 = vrsqrt.f32 %v914_v14  ;;  %vm983_vm8 = vmor %vm981_vm7, %vm982_vm6  ;;  %vm991_vm10 = vweird.f32 %v914_v14 }
 0x1a7   : > { %v977_v47 = vmul.f32 %v1836_v56, %v976_v15  ;;  %v974_v48 = vsel %vm973_vm5, %v1834_v54, %v970_v7 }
 0x1a8   : > { %1672 = vmatmul.msk.f32.gmra.mxu0 %vm1011_vm4, %v974_v48  ;;  %1680 = vmatmul.msk.f32.gmra.mxu1 %vm1011_vm4, %v974_v48  ;;  %v1008_v57 = vmul.f32 %v1000_v2, %v974_v48 }
 0x1a9   : > { %v978_v49 = vmul.f32 0.5, %v977_v47  ;;  %1688 = vmatmul.msk.f32.gmra.mxu2 %vm1011_vm4, %v974_v48  ;;  %1696 = vmatmul.msk.f32.gmra.mxu3 %vm1011_vm4, %v974_v48 }
 0x1aa   : > { %v1017_v50 = vsel %vm1011_vm4, %v1008_v57, 1.0 }
 0x1ab   : > { %v979_v62 = vsub.f32 1.5, %v978_v49 }
 0x1ac   : > { %v1838_v59 = vpop.eup %1837 }
 0x1ad   : > { %v986_v13 = vmul.f32 %v1838_v59, %v914_v14  ;;  %v980_v60 = vmul.f32 %v1836_v56, %v979_v62  ;;  %vm992_vm9 = vweird.f32 %v1838_v59 }
 0x1ae   : > { %vm993_vm11 = vmor %vm991_vm10, %vm992_vm9 }
 0x1af   : > { %v987_v52 = vmul.f32 %v1838_v59, %v986_v13  ;;  %v984_v11 = vsel %vm983_vm8, %v1836_v56, %v980_v60 }
 0x1b0   : > { %1673 = vmatmul.msk.f32.gmra.mxu0 %vm1011_vm4, %v984_v11  ;;  %1681 = vmatmul.msk.f32.gmra.mxu1 %vm1011_vm4, %v984_v11  ;;  %v1009_v8 = vmul.f32 %v1001_v10, %v984_v11 }
 0x1b1   : > { %v988_v41 = vmul.f32 0.5, %v987_v52  ;;  %1689 = vmatmul.msk.f32.gmra.mxu2 %vm1011_vm4, %v984_v11  ;;  %1697 = vmatmul.msk.f32.gmra.mxu3 %vm1011_vm4, %v984_v11 }
 0x1b2   : > { %v1018_v58 = vsel %vm1011_vm4, %v1009_v8, 1.0 }
 0x1b3   : > { %v989_v45 = vsub.f32 1.5, %v988_v41 }
 0x1b5   : > { %v990_v12 = vmul.f32 %v1838_v59, %v989_v45 }
 0x1b7   : > { %v994_v44 = vsel %vm993_vm11, %v1838_v59, %v990_v12 }
 0x1b8   : > { %1674 = vmatmul.msk.f32.gmra.mxu0 %vm1011_vm4, %v994_v44  ;;  %1682 = vmatmul.msk.f32.gmra.mxu1 %vm1011_vm4, %v994_v44  ;;  %v1010_v40 = vmul.f32 %v1002_v0, %v994_v44 }
 0x1b9   : > { %1690 = vmatmul.msk.f32.gmra.mxu2 %vm1011_vm4, %v994_v44  ;;  %1698 = vmatmul.msk.f32.gmra.mxu3 %vm1011_vm4, %v994_v44 }
 0x1ba   : > { %v1019_v54 = vsel %vm1011_vm4, %v1010_v40, 1.0 }
 0x1c0   : > { %1700 = vmatmul.msk.f32.vlgmr.msra.gmra.mxu0 %vm1228_vm12, %v1012_v61  ;;  %1709 = vmatmul.msk.f32.vlgmr.msra.gmra.mxu1 %vm1228_vm12, %v1012_v61 }
 0x1c1   : > { %1718 = vmatmul.msk.f32.vlgmr.msra.gmra.mxu2 %vm1228_vm12, %v1012_v61  ;;  %1727 = vmatmul.msk.f32.vlgmr.msra.gmra.mxu3 %vm1228_vm12, %v1012_v61 }
 0x1c8   : > { %1701 = vmatmul.msk.f32.gmra.mxu0 %vm1228_vm12, %v2853_v16  ;;  %1710 = vmatmul.msk.f32.gmra.mxu1 %vm1228_vm12, %v2853_v16 }
 0x1c9   : > { %1719 = vmatmul.msk.f32.gmra.mxu2 %vm1228_vm12, %v2853_v16  ;;  %1728 = vmatmul.msk.f32.gmra.mxu3 %vm1228_vm12, %v2853_v16 }
 0x1d0   : > { %1702 = vmatmul.msk.f32.gmra.mxu0 %vm1228_vm12, %v2887_v1  ;;  %1711 = vmatmul.msk.f32.gmra.mxu1 %vm1228_vm12, %v2887_v1 }
 0x1d1   : > { %1720 = vmatmul.msk.f32.gmra.mxu2 %vm1228_vm12, %v2887_v1  ;;  %1729 = vmatmul.msk.f32.gmra.mxu3 %vm1228_vm12, %v2887_v1 }
 0x1d8   : > { %1703 = vmatmul.msk.f32.gmra.mxu0 %vm1228_vm12, %v2921_v46  ;;  %1712 = vmatmul.msk.f32.gmra.mxu1 %vm1228_vm12, %v2921_v46 }
 0x1d9   : > { %1721 = vmatmul.msk.f32.gmra.mxu2 %vm1228_vm12, %v2921_v46  ;;  %1730 = vmatmul.msk.f32.gmra.mxu3 %vm1228_vm12, %v2921_v46 }
 0x1e0   : > { %1704 = vmatmul.msk.f32.gmra.mxu0 %vm1228_vm12, %v2936_v55  ;;  %1713 = vmatmul.msk.f32.gmra.mxu1 %vm1228_vm12, %v2936_v55 }
 0x1e1   : > { %1722 = vmatmul.msk.f32.gmra.mxu2 %vm1228_vm12, %v2936_v55  ;;  %1731 = vmatmul.msk.f32.gmra.mxu3 %vm1228_vm12, %v2936_v55 }
 0x1e8   : > { %1705 = vmatmul.msk.f32.gmra.mxu0 %vm1228_vm12, %v1017_v50  ;;  %1714 = vmatmul.msk.f32.gmra.mxu1 %vm1228_vm12, %v1017_v50 }
 0x1e9   : > { %1723 = vmatmul.msk.f32.gmra.mxu2 %vm1228_vm12, %v1017_v50  ;;  %1732 = vmatmul.msk.f32.gmra.mxu3 %vm1228_vm12, %v1017_v50 }
 0x1f0   : > { %1706 = vmatmul.msk.f32.gmra.mxu0 %vm1228_vm12, %v1018_v58  ;;  %1715 = vmatmul.msk.f32.gmra.mxu1 %vm1228_vm12, %v1018_v58 }
 0x1f1   : > { %1724 = vmatmul.msk.f32.gmra.mxu2 %vm1228_vm12, %v1018_v58  ;;  %1733 = vmatmul.msk.f32.gmra.mxu3 %vm1228_vm12, %v1018_v58 }
 0x1f8   : > { %1707 = vmatmul.msk.f32.gmra.mxu0 %vm1228_vm12, %v1019_v54  ;;  %1716 = vmatmul.msk.f32.gmra.mxu1 %vm1228_vm12, %v1019_v54 }
 0x1f9   : > { %1725 = vmatmul.msk.f32.gmra.mxu2 %vm1228_vm12, %v1019_v54  ;;  %1734 = vmatmul.msk.f32.gmra.mxu3 %vm1228_vm12, %v1019_v54 }
 0x1fd   : > { %v1069_v43 = vpop.f32.mrf.mxu0  ;;  %v1110_v35 = vpop.f32.mrf.mxu1 }
 0x1fe   : > { %v1430_v50 = vmul.f32 %v1069_v43, %v2542_v20  ;;  %v1431_v62 = vmul.f32 %v1110_v35, %v2544_v21 }
 0x204   : > { %v1151_v16 = vpop.f32.mrf.mxu2  ;;  %v1192_v1 = vpop.f32.mrf.mxu3 }
 0x205   : > { %v1072_v46 = vpop.f32.mrf.mxu0  ;;  %v1113_v18 = vpop.f32.mrf.mxu1  ;;  %v1432_v20 = vmul.f32 %v1151_v16, %v2555_v22  ;;  %v1433_v21 = vmul.f32 %v1192_v1, %v2557_v23 }
 0x206   : > { %v1434_v8 = vmul.f32 %v1072_v46, %v2561_v24  ;;  %v1435_v41 = vmul.f32 %v1113_v18, %v2563_v25 }
 0x20c   : > { %v1154_v63 = vpop.f32.mrf.mxu2  ;;  %v1195_v3 = vpop.f32.mrf.mxu3 }
 0x20d   : > { %v1075_v4 = vpop.f32.mrf.mxu0  ;;  %v1116_v5 = vpop.f32.mrf.mxu1  ;;  %v1436_v22 = vmul.f32 %v1154_v63, %v2567_v26  ;;  %v1437_v23 = vmul.f32 %v1195_v3, %v2569_v27 }
 0x20e   : > { %v1438_v24 = vmul.f32 %v1075_v4, %v2573_v28  ;;  %v1439_v25 = vmul.f32 %v1116_v5, %v2575_v29 }
 0x214   : > { %v3008_v17 = vpop.f32.mrf.mxu2  ;;  %v3010_v6 = vpop.f32.mrf.mxu3 }
 0x215   : > { %v3012_v9 = vpop.f32.mrf.mxu0  ;;  %v3014_v42 = vpop.f32.mrf.mxu1  ;;  %v1440_v26 = vmul.f32 %v3008_v17, %v2579_v30  ;;  %v1441_v27 = vmul.f32 %v3010_v6, %v2581_v31  ;;  %v3226_v30 = vld [vmem:[#allocation5_spill] sm:$0xff]  ;;  %v3228_v17 = vld [vmem:[#allocation7_spill] sm:$0xff] }
 0x216   : > { %v1442_v28 = vmul.f32 %v3012_v9, %v2585_v33  ;;  %v1443_v29 = vmul.f32 %v3014_v42, %v2587_v34  ;;  %v3227_v33 = vld [vmem:[#allocation6_spill] sm:$0xff]  ;;  %v3229_v9 = vld [vmem:[#allocation8_spill] sm:$0xff] }
 0x21c   : > { %v3016_v51 = vpop.f32.mrf.mxu2  ;;  %v3018_v36 = vpop.f32.mrf.mxu3 }
 0x21d   : > { %v3020_v32 = vpop.f32.mrf.mxu0  ;;  %v3022_v37 = vpop.f32.mrf.mxu1  ;;  %v1444_v31 = vmul.f32 %v3016_v51, %v3226_v30  ;;  %v1445_v34 = vmul.f32 %v3018_v36, %v3227_v33  ;;  %v3230_v51 = vld [vmem:[#allocation9_spill] sm:$0xff] }
 0x21e   : > { %v1446_v6 = vmul.f32 %v3020_v32, %v3228_v17  ;;  %v1447_v42 = vmul.f32 %v3022_v37, %v3229_v9  ;;  %v3231_v32 = vld [vmem:[#allocation10_spill] sm:$0xff] }
 0x224   : > { %v3024_v39 = vpop.f32.mrf.mxu2  ;;  %v3026_v55 = vpop.f32.mrf.mxu3 }
 0x225   : > { %v3028_v19 = vpop.f32.mrf.mxu0  ;;  %v3030_v56 = vpop.f32.mrf.mxu1  ;;  %v1448_v36 = vmul.f32 %v3024_v39, %v3230_v51  ;;  %v1449_v37 = vmul.f32 %v3026_v55, %v3231_v32  ;;  %v3234_v39 = vld [vmem:[#allocation13_spill] sm:$0xff] }
 0x22c   : > { %v3032_v14 = vpop.f32.mrf.mxu2  ;;  %v3034_v15 = vpop.f32.mrf.mxu3 }
 0x22d   : > { %v3036_v7 = vpop.f32.mrf.mxu0  ;;  %v3038_v2 = vpop.f32.mrf.mxu1  ;;  %v1452_v55 = vmul.f32 %v3032_v14, %v3234_v39  ;;  %v3238_v14 = vld [vmem:[#allocation17_spill] sm:$0xff] }
 0x234   : > { %v3040_v47 = vpop.f32.mrf.mxu2  ;;  %v3042_v48 = vpop.f32.mrf.mxu3 }
 0x235   : > { %v3044_v57 = vpop.f32.mrf.mxu0  ;;  %v3046_v49 = vpop.f32.mrf.mxu1 }
 0x23c   : > { %v3053_v59 = vpop.f32.mrf.mxu2  ;;  %v3055_v13 = vpop.f32.mrf.mxu3 }
 0x23d   : > { %v1283_v60 = vpop.f32.mrf.mxu0  ;;  %v1324_v10 = vpop.f32.mrf.mxu1 }
 0x23e   : > { %v1462_v52 = vadd.f32 %v1430_v50, %v1283_v60  ;;  %v1463_v11 = vadd.f32 %v1431_v62, %v1324_v10 }
 0x240   : > { %1494 = vst [vmem:[%s3057_s11] sm:$0xff] %v1462_v52 }
 0x241   : > { %1735 = vst [vmem:[%s3057_s11 + $0x8] sm:$0xff] %v1463_v11 }
 0x244   : > { %v1365_v58 = vpop.f32.mrf.mxu2  ;;  %v1406_v45 = vpop.f32.mrf.mxu3 }
 0x245   : > { %v1464_v12 = vadd.f32 %v1432_v20, %v1365_v58  ;;  %v1465_v0 = vadd.f32 %v1433_v21, %v1406_v45  ;;  %v1286_v44 = vpop.f32.mrf.mxu0  ;;  %v1327_v40 = vpop.f32.mrf.mxu1 }
 0x246   : > { %v1466_v38 = vadd.f32 %v1434_v8, %v1286_v44  ;;  %v1467_v54 = vadd.f32 %v1435_v41, %v1327_v40  ;;  %v3233_v44 = vld [vmem:[#allocation12_spill] sm:$0xff] }
 0x247   : > { %1743 = vst [vmem:[%s3057_s11 + $0x10] sm:$0xff] %v1464_v12  ;;  %v3232_v12 = vld [vmem:[#allocation11_spill] sm:$0xff]  ;;  %v1451_v40 = vmul.f32 %v3030_v56, %v3233_v44 }
 0x248   : > { %1751 = vst [vmem:[%s3057_s11 + $0x18] sm:$0xff] %v1465_v0  ;;  %v1450_v0 = vmul.f32 %v3028_v19, %v3232_v12  ;;  %v3235_v19 = vld [vmem:[#allocation14_spill] sm:$0xff] }
 0x249   : > { %1495 = vst [vmem:[%s3057_s11 + $0x20] sm:$0xff] %v1466_v38  ;;  %v1453_v56 = vmul.f32 %v3034_v15, %v3235_v19  ;;  %v1456_v15 = vmul.f32 %v3040_v47, %v3238_v14 }
 0x24a   : > { %1736 = vst [vmem:[%s3057_s11 + $0x28] sm:$0xff] %v1467_v54 }
 0x24c   : > { %v1368_v53 = vpop.f32.mrf.mxu2  ;;  %v1409_v61 = vpop.f32.mrf.mxu3 }
 0x24d   : > { %v1468_v43 = vadd.f32 %v1436_v22, %v1368_v53  ;;  %v1469_v35 = vadd.f32 %v1437_v23, %v1409_v61  ;;  %v1289_v16 = vpop.f32.mrf.mxu0  ;;  %v1330_v1 = vpop.f32.mrf.mxu1 }
 0x24e   : > { %v1470_v46 = vadd.f32 %v1438_v24, %v1289_v16  ;;  %v1471_v18 = vadd.f32 %v1439_v25, %v1330_v1  ;;  %v3237_v16 = vld [vmem:[#allocation16_spill] sm:$0xff] }
 0x24f   : > { %1744 = vst [vmem:[%s3057_s11 + $0x30] sm:$0xff] %v1468_v43  ;;  %v3236_v43 = vld [vmem:[#allocation15_spill] sm:$0xff]  ;;  %v1455_v1 = vmul.f32 %v3038_v2, %v3237_v16 }
 0x250   : > { %1752 = vst [vmem:[%s3057_s11 + $0x38] sm:$0xff] %v1469_v35  ;;  %v1454_v35 = vmul.f32 %v3036_v7, %v3236_v43  ;;  %v3239_v7 = vld [vmem:[#allocation18_spill] sm:$0xff] }
 0x251   : > { %1496 = vst [vmem:[%s3057_s11 + $0x40] sm:$0xff] %v1470_v46  ;;  %v1457_v2 = vmul.f32 %v3042_v48, %v3239_v7  ;;  %v3242_v48 = vld [vmem:[#allocation21_spill] sm:$0xff] }
 0x252   : > { %1737 = vst [vmem:[%s3057_s11 + $0x48] sm:$0xff] %v1471_v18 }
 0x254   : > { %v1371_v63 = vpop.f32.mrf.mxu2  ;;  %v1412_v3 = vpop.f32.mrf.mxu3 }
 0x255   : > { %v1472_v4 = vadd.f32 %v1440_v26, %v1371_v63  ;;  %v1473_v5 = vadd.f32 %v1441_v27, %v1412_v3  ;;  %v1292_v50 = vpop.f32.mrf.mxu0  ;;  %v1333_v62 = vpop.f32.mrf.mxu1 }
 0x256   : > { %v1474_v60 = vadd.f32 %v1442_v28, %v1292_v50  ;;  %v1475_v10 = vadd.f32 %v1443_v29, %v1333_v62  ;;  %v3241_v50 = vld [vmem:[#allocation20_spill] sm:$0xff] }
 0x257   : > { %1745 = vst [vmem:[%s3057_s11 + $0x50] sm:$0xff] %v1472_v4  ;;  %v3240_v4 = vld [vmem:[#allocation19_spill] sm:$0xff]  ;;  %v1459_v62 = vmul.f32 %v3046_v49, %v3241_v50  ;;  %v3243_v49 = vld [vmem:[#allocation22_spill] sm:$0xff] }
 0x258   : > { %1753 = vst [vmem:[%s3057_s11 + $0x58] sm:$0xff] %v1473_v5  ;;  %v1458_v5 = vmul.f32 %v3044_v57, %v3240_v4  ;;  %v1460_v57 = vmul.f32 %v3053_v59, %v3242_v48 }
 0x259   : > { %1497 = vst [vmem:[%s3057_s11 + $0x60] sm:$0xff] %v1474_v60 }
 0x25a   : > { %1738 = vst [vmem:[%s3057_s11 + $0x68] sm:$0xff] %v1475_v10 }
 0x25c   : > { %v1374_v52 = vpop.f32.mrf.mxu2  ;;  %v1415_v11 = vpop.f32.mrf.mxu3 }
 0x25d   : > { %v1476_v20 = vadd.f32 %v1444_v31, %v1374_v52  ;;  %v1477_v21 = vadd.f32 %v1445_v34, %v1415_v11  ;;  %v1295_v8 = vpop.f32.mrf.mxu0  ;;  %v1336_v41 = vpop.f32.mrf.mxu1 }
 0x25e   : > { %v1478_v58 = vadd.f32 %v1446_v6, %v1295_v8  ;;  %v1479_v45 = vadd.f32 %v1447_v42, %v1336_v41  ;;  %v1461_v6 = vmul.f32 %v3055_v13, %v3243_v49 }
 0x25f   : > { %1746 = vst [vmem:[%s3057_s11 + $0x70] sm:$0xff] %v1476_v20 }
 0x260   : > { %1754 = vst [vmem:[%s3057_s11 + $0x78] sm:$0xff] %v1477_v21 }
 0x261   : > { %1498 = vst [vmem:[%s3057_s11 + $0x80] sm:$0xff] %v1478_v58 }
 0x262   : > { %1739 = vst [vmem:[%s3057_s11 + $0x88] sm:$0xff] %v1479_v45 }
 0x264   : > { %v1377_v38 = vpop.f32.mrf.mxu2  ;;  %v1418_v54 = vpop.f32.mrf.mxu3 }
 0x265   : > { %v1480_v22 = vadd.f32 %v1448_v36, %v1377_v38  ;;  %v1481_v23 = vadd.f32 %v1449_v37, %v1418_v54  ;;  %v1298_v24 = vpop.f32.mrf.mxu0  ;;  %v1339_v25 = vpop.f32.mrf.mxu1 }
 0x266   : > { %v1482_v53 = vadd.f32 %v1450_v0, %v1298_v24  ;;  %v1483_v61 = vadd.f32 %v1451_v40, %v1339_v25 }
 0x267   : > { %1747 = vst [vmem:[%s3057_s11 + $0x90] sm:$0xff] %v1480_v22 }
 0x268   : > { %1755 = vst [vmem:[%s3057_s11 + $0x98] sm:$0xff] %v1481_v23 }
 0x269   : > { %1499 = vst [vmem:[%s3057_s11 + $0xa0] sm:$0xff] %v1482_v53 }
 0x26a   : > { %1740 = vst [vmem:[%s3057_s11 + $0xa8] sm:$0xff] %v1483_v61 }
 0x26c   : > { %v1380_v46 = vpop.f32.mrf.mxu2  ;;  %v1421_v18 = vpop.f32.mrf.mxu3 }
 0x26d   : > { %v1484_v26 = vadd.f32 %v1452_v55, %v1380_v46  ;;  %v1485_v27 = vadd.f32 %v1453_v56, %v1421_v18  ;;  %v1301_v28 = vpop.f32.mrf.mxu0  ;;  %v1342_v29 = vpop.f32.mrf.mxu1 }
 0x26e   : > { %v1486_v63 = vadd.f32 %v1454_v35, %v1301_v28  ;;  %v1487_v3 = vadd.f32 %v1455_v1, %v1342_v29 }
 0x26f   : > { %1748 = vst [vmem:[%s3057_s11 + $0xb0] sm:$0xff] %v1484_v26 }
 0x270   : > { %1756 = vst [vmem:[%s3057_s11 + $0xb8] sm:$0xff] %v1485_v27 }
 0x271   : > { %1500 = vst [vmem:[%s3057_s11 + $0xc0] sm:$0xff] %v1486_v63 }
 0x272   : > { %1741 = vst [vmem:[%s3057_s11 + $0xc8] sm:$0xff] %v1487_v3 }
 0x274   : > { %v1383_v60 = vpop.f32.mrf.mxu2  ;;  %v1424_v10 = vpop.f32.mrf.mxu3 }
 0x275   : > { %v1488_v30 = vadd.f32 %v1456_v15, %v1383_v60  ;;  %v1489_v31 = vadd.f32 %v1457_v2, %v1424_v10  ;;  %v1304_v33 = vpop.f32.mrf.mxu0  ;;  %v1345_v34 = vpop.f32.mrf.mxu1 }
 0x276   : > { %v1490_v47 = vadd.f32 %v1458_v5, %v1304_v33  ;;  %v1491_v17 = vadd.f32 %v1459_v62, %v1345_v34 }
 0x277   : > { %1749 = vst [vmem:[%s3057_s11 + $0xd0] sm:$0xff] %v1488_v30 }
 0x278   : > { %1757 = vst [vmem:[%s3057_s11 + $0xd8] sm:$0xff] %v1489_v31 }
 0x279   : > { %1501 = vst [vmem:[%s3057_s11 + $0xe0] sm:$0xff] %v1490_v47 }
 0x27a   : > { %1742 = vst [vmem:[%s3057_s11 + $0xe8] sm:$0xff] %v1491_v17 }
 0x27c   : > { %v1386_v9 = vpop.f32.mrf.mxu2  ;;  %v1427_v42 = vpop.f32.mrf.mxu3 }
 0x27d   : > { %v1492_v52 = vadd.f32 %v1460_v57, %v1386_v9  ;;  %v1493_v11 = vadd.f32 %v1461_v6, %v1427_v42 }
 0x27f   : > { %1750 = vst [vmem:[%s3057_s11 + $0xf0] sm:$0xff] %v1492_v52 }
 0x280   : > { %1758 = vst [vmem:[%s3057_s11 + $0xf8] sm:$0xff] %v1493_v11 }
 0x281   : > { %1866 = shalt.err (!%p1863_p5)
}
 0x282   : > { %s1919_s8 = smov 128   ;;  %s1920_s11 = smov 8  }
 0x283   : > { %1766 = dma.vmem_to_hbm [thread:$0]  (%p1991_p4), %s1546_s14, 4096, %s1548_s16, %s1530_s21, %s1919_s8, %s1919_s8, %s1920_s11  }
 0x284 PF: > { %p1772_p6 = scmp.ge.s32.totalorder %s1917_s23, 2  ;;  %s1562_s12 = sand.u32 1, %s1897_s18  }
 0x285   : > { %s1563_s13 = scalar_lea.sflag [#allocation3], %s1562_s12 }
 0x286   : > { %p1769_p7 = pnand %p1772_p6, %p1998_p8 }
 0x288   : > { %p1770_p9 = pneg %p1769_p7 }
 0x28a   : > { %1892 = dma.done.wait (%p1770_p9), %s1563_s13, 4096  }
 0x28b   : > { %1894 = vsyncadd (%p1770_p9), %s1563_s13, 4294963200  ;;  %s18_s23 = sadd.s32 1, %s1917_s23   ;;  %s3244_s18 = smov %s1901_s19 }
 0x28c   : > { %p15_p10 = scmp.ge.s32.totalorder %s18_s23, 4   ;;  %s3245_s19 = smov %s1905_s20 }
 0x28d   : > { %s3246_s20 = smov %s2004_s6  ;;  %s3247_s21 = smov %s1913_s22 }
 0x28e   : > { %s3248_s22 = smov %s3250_s26  ;;  %17 = sbr.rel (!%p15_p10) target bundleno = 4 (0x4), region = 78 }
 0x293   :  { %1569 = vsyncpa [#allocation3], 1 }
 0x294   :  { %1571 = vsyncpa [#allocation3 + $0x1], 1 }

</bundles_post_ra>
